<compile_context>
chip_gen: v7x
topology: tpu7x:2x2x1
jax: 0.10.0
libtpu: 0.0.40
codegen_flags: <defaults>
</compile_context>

<pallas_src>
import functools
import math

import jax
import jax.numpy as jnp
from jax import lax
from jax.experimental import pallas as pl
from jax.experimental.pallas import tpu as pltpu  # noqa: F401  (TPU backend)

# ---------------- model hyper-parameters (small, consistent with module) ----
VOCAB_SIZE = 64
N_LAYERS = 2
N_HEADS = 2
N_CTX = 8
D_MODEL = 32
D_HEAD = 16
D_FF = 4 * D_MODEL
PAD_IDX = 0
LN_EPS = 1e-5
NEG_INF = -1e9
V_PAD = ((VOCAB_SIZE + 127) // 128) * 128  # lane-dense LM-head output width


def _layer_norm(x, g, b):
    mu = jnp.mean(x, axis=-1, keepdims=True)
    var = jnp.mean((x - mu) ** 2, axis=-1, keepdims=True)
    return (x - mu) * lax.rsqrt(var + LN_EPS) * g + b


# ---------------- fused full-model kernel ------------------------------------
def fused_lm_kernel(x_ref, bias_ref,
                    wq_ref, wk_ref, wv_ref, bq_ref, bk_ref, bv_ref,
                    wo_ref, bo_ref, ln1g_ref, ln1b_ref,
                    wff1_ref, bff1_ref, wff2_ref, bff2_ref,
                    ln2g_ref, ln2b_ref, lmw_ref, lmb_ref,
                    out_ref, *, n_layers, n_heads, d_head, batch, seq):
    B, T, Dh = batch, seq, d_head
    D = x_ref.shape[-1]

    x2 = x_ref[...].reshape(B * T, D)      # (B*T, D) activation slab
    bias = bias_ref[...]                   # (B, T, T) causal + key-pad additive bias

    for l in range(n_layers):              # static unroll over layers (weights resident)
        # ---- multi-head attention (head-major weights; no lane slicing / concat) ----
        attn2 = jnp.zeros_like(x2)
        for h in range(n_heads):
            q = (jnp.dot(x2, wq_ref[l, h], preferred_element_type=jnp.float32)
                 + bq_ref[l, h]).reshape(B, T, Dh)        # scale pre-folded into Wq
            k = (jnp.dot(x2, wk_ref[l, h], preferred_element_type=jnp.float32)
                 + bk_ref[l, h]).reshape(B, T, Dh)
            v = (jnp.dot(x2, wv_ref[l, h], preferred_element_type=jnp.float32)
                 + bv_ref[l, h]).reshape(B, T, Dh)

            s = jnp.einsum('bqd,bkd->bqk', q, k,
                           preferred_element_type=jnp.float32) + bias     # (B,T,T)
            s = s - jnp.max(s, axis=-1, keepdims=True)                    # stable softmax
            p = jnp.exp(s)
            p = p * pl.reciprocal(jnp.sum(p, axis=-1, keepdims=True), approx=True)

            o = jnp.einsum('bqk,bkd->bqd', p, v,
                           preferred_element_type=jnp.float32)            # (B,T,Dh)
            # accumulate head contribution of output projection (no lane concat)
            attn2 = attn2 + jnp.dot(o.reshape(B * T, Dh), wo_ref[l, h],
                                    preferred_element_type=jnp.float32)
        attn2 = attn2 + bo_ref[l]

        h1 = _layer_norm(x2 + attn2, ln1g_ref[l], ln1b_ref[l])

        # ---- feed-forward ----
        ff = jnp.dot(h1, wff1_ref[l], preferred_element_type=jnp.float32) + bff1_ref[l]
        ff = jax.nn.gelu(ff)
        ff = jnp.dot(ff, wff2_ref[l], preferred_element_type=jnp.float32) + bff2_ref[l]

        x2 = _layer_norm(h1 + ff, ln2g_ref[l], ln2b_ref[l])

    # ---- LM head: lane-dense (B*T, V_PAD) store ----
    out_ref[...] = (jnp.dot(x2, lmw_ref[...], preferred_element_type=jnp.float32)
                    + lmb_ref[...])


# ---------------- parameter init (deterministic, PyTorch-like) ---------------
def init_params(key):
    keys = iter(jax.random.split(key, 6 + N_LAYERS * 8))
    p = {}
    # token embedding ~ N(0,1), padding_idx row zeroed (PyTorch semantics)
    tok = jax.random.normal(next(keys), (VOCAB_SIZE, D_MODEL), jnp.float32)
    p["tok_emb"] = tok.at[PAD_IDX].set(0.0)
    # learned positional embedding ~ N(0,1)
    p["pos_emb"] = jax.random.normal(next(keys), (1, N_CTX, D_MODEL), jnp.float32)

    layers = []
    for _ in range(N_LAYERS):
        lp = {
            "wqkv": 0.02 * jax.random.normal(next(keys), (D_MODEL, 3 * N_HEADS * D_HEAD)),
            "bqkv": jnp.zeros((1, 3 * N_HEADS * D_HEAD), jnp.float32),
            "wo":   0.02 * jax.random.normal(next(keys), (N_HEADS * D_HEAD, D_MODEL)),
            "bo":   jnp.zeros((1, D_MODEL), jnp.float32),
            "ln1g": jnp.ones((1, D_MODEL), jnp.float32),
            "ln1b": jnp.zeros((1, D_MODEL), jnp.float32),
            "wff1": 0.02 * jax.random.normal(next(keys), (D_MODEL, D_FF)),
            "bff1": jnp.zeros((1, D_FF), jnp.float32),
            "wff2": 0.02 * jax.random.normal(next(keys), (D_FF, D_MODEL)),
            "bff2": jnp.zeros((1, D_MODEL), jnp.float32),
            "ln2g": jnp.ones((1, D_MODEL), jnp.float32),
            "ln2b": jnp.zeros((1, D_MODEL), jnp.float32),
        }
        layers.append(lp)
    p["layers"] = layers
    # final LinearNormal: weight stored as (in, out)
    p["lm_w"] = 0.02 * jax.random.normal(next(keys), (D_MODEL, VOCAB_SIZE))
    p["lm_b"] = jnp.zeros((1, VOCAB_SIZE), jnp.float32)
    return p


# ---------------- weight prep for the fused kernel ---------------------------
def prepare_weights(params):
    """Head-major, layer-stacked weights for the fused kernel.

    Folds the 1/sqrt(d_head) attention scale into the Q projection and zero-pads
    the LM head to a 128-lane-dense output width.
    """
    hd = N_HEADS * D_HEAD
    scale = 1.0 / math.sqrt(D_HEAD)

    def split_w(w):   # (D, H*Dh) -> (H, D, Dh)
        return w.reshape(D_MODEL, N_HEADS, D_HEAD).transpose(1, 0, 2)

    def split_b(b):   # (1, H*Dh) -> (H, 1, Dh)
        return b.reshape(N_HEADS, D_HEAD)[:, None, :]

    names = ("wq", "wk", "wv", "bq", "bk", "bv", "wo", "bo",
             "ln1g", "ln1b", "wff1", "bff1", "wff2", "bff2", "ln2g", "ln2b")
    per = {k: [] for k in names}
    for lp in params["layers"]:
        wqkv, bqkv = lp["wqkv"], lp["bqkv"]
        per["wq"].append(split_w(wqkv[:, :hd]) * scale)
        per["wk"].append(split_w(wqkv[:, hd:2 * hd]))
        per["wv"].append(split_w(wqkv[:, 2 * hd:]))
        per["bq"].append(split_b(bqkv[:, :hd]) * scale)
        per["bk"].append(split_b(bqkv[:, hd:2 * hd]))
        per["bv"].append(split_b(bqkv[:, 2 * hd:]))
        per["wo"].append(lp["wo"].reshape(N_HEADS, D_HEAD, D_MODEL))
        per["bo"].append(lp["bo"])
        for k in ("ln1g", "ln1b", "wff1", "bff1", "wff2", "bff2", "ln2g", "ln2b"):
            per[k].append(lp[k])
    stacked = {k: jnp.stack(v).astype(jnp.float32) for k, v in per.items()}

    lm_w = jnp.pad(params["lm_w"], ((0, 0), (0, V_PAD - VOCAB_SIZE))).astype(jnp.float32)
    lm_b = jnp.pad(params["lm_b"], ((0, 0), (0, V_PAD - VOCAB_SIZE))).astype(jnp.float32)

    weights = tuple(stacked[k] for k in names) + (lm_w, lm_b)
    return {"tok_emb": params["tok_emb"], "pos_emb": params["pos_emb"],
            "weights": weights}


# ---------------- full forward pass ------------------------------------------
@jax.jit
def transformer_lm_forward(prep, ctx):
    """ctx: (B, T) int32 token ids -> logits (B, T, VOCAB_SIZE) float32."""
    B, T = ctx.shape
    # glue (cheap XLA ops): embedding gather + learned positions; dropout = identity.
    embed = jnp.take(prep["tok_emb"], ctx, axis=0) + prep["pos_emb"]         # (B,T,D)
    # combined causal + key-pad additive bias, built once for all layers.
    pad_bias = jnp.where(ctx == PAD_IDX, NEG_INF, 0.0).astype(jnp.float32)   # (B,T)
    row = lax.broadcasted_iota(jnp.int32, (T, T), 0)
    col = lax.broadcasted_iota(jnp.int32, (T, T), 1)
    causal = jnp.where(col > row, NEG_INF, 0.0).astype(jnp.float32)          # (T,T)
    bias = causal[None, :, :] + pad_bias[:, None, :]                         # (B,T,T)

    kernel = functools.partial(fused_lm_kernel, n_layers=N_LAYERS, n_heads=N_HEADS,
                               d_head=D_HEAD, batch=B, seq=T)
    logits_flat = pl.pallas_call(
        kernel,
        out_shape=jax.ShapeDtypeStruct((B * T, V_PAD), jnp.float32),
    )(embed.astype(jnp.float32), bias, *prep["weights"])
    return logits_flat[:, :VOCAB_SIZE].reshape(B, T, VOCAB_SIZE)


if __name__ == "__main__":
    key = jax.random.PRNGKey(0)
    pkey, dkey = jax.random.split(key)
    params = init_params(pkey)
    prep = prepare_weights(params)

    B = 2
    ctx = jax.random.randint(dkey, (B, N_CTX), 1, VOCAB_SIZE, dtype=jnp.int32)
    ctx = ctx.at[:, -2:].set(PAD_IDX)  # a couple of padded positions at the end

    logits = transformer_lm_forward(prep, ctx)
    logits = jax.block_until_ready(logits)

    assert logits.shape == (B, N_CTX, VOCAB_SIZE), logits.shape
    assert bool(jnp.all(jnp.isfinite(logits)))
    print("KERNEL_OK")
</pallas_src>

<mosaic_0001>
module attributes {stable_mosaic.version = 11 : i64} {
  func.func @fused_lm_kernel(%arg0: memref<2x8x32xf32, #tpu.memory_space<vmem>>, %arg1: memref<2x8x8xf32, #tpu.memory_space<vmem>>, %arg2: memref<2x2x32x16xf32, #tpu.memory_space<vmem>>, %arg3: memref<2x2x32x16xf32, #tpu.memory_space<vmem>>, %arg4: memref<2x2x32x16xf32, #tpu.memory_space<vmem>>, %arg5: memref<2x2x1x16xf32, #tpu.memory_space<vmem>>, %arg6: memref<2x2x1x16xf32, #tpu.memory_space<vmem>>, %arg7: memref<2x2x1x16xf32, #tpu.memory_space<vmem>>, %arg8: memref<2x2x16x32xf32, #tpu.memory_space<vmem>>, %arg9: memref<2x1x32xf32, #tpu.memory_space<vmem>>, %arg10: memref<2x1x32xf32, #tpu.memory_space<vmem>>, %arg11: memref<2x1x32xf32, #tpu.memory_space<vmem>>, %arg12: memref<2x32x128xf32, #tpu.memory_space<vmem>>, %arg13: memref<2x1x128xf32, #tpu.memory_space<vmem>>, %arg14: memref<2x128x32xf32, #tpu.memory_space<vmem>>, %arg15: memref<2x1x32xf32, #tpu.memory_space<vmem>>, %arg16: memref<2x1x32xf32, #tpu.memory_space<vmem>>, %arg17: memref<2x1x32xf32, #tpu.memory_space<vmem>>, %arg18: memref<32x128xf32, #tpu.memory_space<vmem>>, %arg19: memref<1x128xf32, #tpu.memory_space<vmem>>, %arg20: memref<16x128xf32, #tpu.memory_space<vmem>>) attributes {dimension_semantics = [], scalar_prefetch = 0 : i64, scratch_operands = 0 : i64, tpu.core_type = #tpu.core_type<tc>} {
    %c0 = arith.constant 0 : index
    %c0_0 = arith.constant 0 : index
    %c0_1 = arith.constant 0 : index
    %0 = vector.load %arg0[%c0, %c0_0, %c0_1] : memref<2x8x32xf32, #tpu.memory_space<vmem>>, vector<2x8x32xf32>
    %1 = vector.shape_cast %0 : vector<2x8x32xf32> to vector<16x32xf32>
    %c0_2 = arith.constant 0 : index
    %c0_3 = arith.constant 0 : index
    %c0_4 = arith.constant 0 : index
    %2 = vector.load %arg1[%c0_2, %c0_3, %c0_4] : memref<2x8x8xf32, #tpu.memory_space<vmem>>, vector<2x8x8xf32>
    %cst = arith.constant 0.000000e+00 : f32
    %3 = vector.broadcast %cst : f32 to vector<16x32xf32>
    %c0_5 = arith.constant 0 : index
    %c0_6 = arith.constant 0 : index
    %c0_7 = arith.constant 0 : index
    %c0_8 = arith.constant 0 : index
    %4 = vector.load %arg2[%c0_5, %c0_6, %c0_7, %c0_8] : memref<2x2x32x16xf32, #tpu.memory_space<vmem>>, vector<1x1x32x16xf32>
    %5 = vector.shape_cast %4 : vector<1x1x32x16xf32> to vector<32x16xf32>
    %cst_9 = arith.constant dense<0.000000e+00> : vector<16x16xf32>
    %6 = tpu.matmul %1, %5, %cst_9 {dimension_numbers = #tpu.dot_dimension_numbers<[1], [0], [0], [1], [0, 0, 1, 1], [], []>} : vector<16x32xf32>, vector<32x16xf32>, vector<16x16xf32> -> vector<16x16xf32>
    %c0_10 = arith.constant 0 : index
    %c0_11 = arith.constant 0 : index
    %c0_12 = arith.constant 0 : index
    %c0_13 = arith.constant 0 : index
    %7 = vector.load %arg5[%c0_10, %c0_11, %c0_12, %c0_13] : memref<2x2x1x16xf32, #tpu.memory_space<vmem>>, vector<1x1x1x16xf32>
    %8 = vector.shape_cast %7 : vector<1x1x1x16xf32> to vector<1x16xf32>
    %9 = vector.broadcast %8 : vector<1x16xf32> to vector<16x16xf32>
    %10 = arith.addf %6, %9 : vector<16x16xf32>
    %11 = vector.shape_cast %10 : vector<16x16xf32> to vector<2x8x16xf32>
    %c0_14 = arith.constant 0 : index
    %c0_15 = arith.constant 0 : index
    %c0_16 = arith.constant 0 : index
    %c0_17 = arith.constant 0 : index
    %12 = vector.load %arg3[%c0_14, %c0_15, %c0_16, %c0_17] : memref<2x2x32x16xf32, #tpu.memory_space<vmem>>, vector<1x1x32x16xf32>
    %13 = vector.shape_cast %12 : vector<1x1x32x16xf32> to vector<32x16xf32>
    %cst_18 = arith.constant dense<0.000000e+00> : vector<16x16xf32>
    %14 = tpu.matmul %1, %13, %cst_18 {dimension_numbers = #tpu.dot_dimension_numbers<[1], [0], [0], [1], [0, 0, 1, 1], [], []>} : vector<16x32xf32>, vector<32x16xf32>, vector<16x16xf32> -> vector<16x16xf32>
    %c0_19 = arith.constant 0 : index
    %c0_20 = arith.constant 0 : index
    %c0_21 = arith.constant 0 : index
    %c0_22 = arith.constant 0 : index
    %15 = vector.load %arg6[%c0_19, %c0_20, %c0_21, %c0_22] : memref<2x2x1x16xf32, #tpu.memory_space<vmem>>, vector<1x1x1x16xf32>
    %16 = vector.shape_cast %15 : vector<1x1x1x16xf32> to vector<1x16xf32>
    %17 = vector.broadcast %16 : vector<1x16xf32> to vector<16x16xf32>
    %18 = arith.addf %14, %17 : vector<16x16xf32>
    %19 = vector.shape_cast %18 : vector<16x16xf32> to vector<2x8x16xf32>
    %c0_23 = arith.constant 0 : index
    %c0_24 = arith.constant 0 : index
    %c0_25 = arith.constant 0 : index
    %c0_26 = arith.constant 0 : index
    %20 = vector.load %arg4[%c0_23, %c0_24, %c0_25, %c0_26] : memref<2x2x32x16xf32, #tpu.memory_space<vmem>>, vector<1x1x32x16xf32>
    %21 = vector.shape_cast %20 : vector<1x1x32x16xf32> to vector<32x16xf32>
    %cst_27 = arith.constant dense<0.000000e+00> : vector<16x16xf32>
    %22 = tpu.matmul %1, %21, %cst_27 {dimension_numbers = #tpu.dot_dimension_numbers<[1], [0], [0], [1], [0, 0, 1, 1], [], []>} : vector<16x32xf32>, vector<32x16xf32>, vector<16x16xf32> -> vector<16x16xf32>
    %c0_28 = arith.constant 0 : index
    %c0_29 = arith.constant 0 : index
    %c0_30 = arith.constant 0 : index
    %c0_31 = arith.constant 0 : index
    %23 = vector.load %arg7[%c0_28, %c0_29, %c0_30, %c0_31] : memref<2x2x1x16xf32, #tpu.memory_space<vmem>>, vector<1x1x1x16xf32>
    %24 = vector.shape_cast %23 : vector<1x1x1x16xf32> to vector<1x16xf32>
    %25 = vector.broadcast %24 : vector<1x16xf32> to vector<16x16xf32>
    %26 = arith.addf %22, %25 : vector<16x16xf32>
    %27 = vector.shape_cast %26 : vector<16x16xf32> to vector<2x8x16xf32>
    "tpu.trace_start"() <{level = 10 : i32, message = "bqd,bkd->bqk"}> : () -> ()
    %cst_32 = arith.constant dense<0.000000e+00> : vector<2x8x8xf32>
    %28 = tpu.matmul %11, %19, %cst_32 {dimension_numbers = #tpu.dot_dimension_numbers<[2], [2], [1], [1], [0, 0, 0, 1, 1, 1], [0], [0]>} : vector<2x8x16xf32>, vector<2x8x16xf32>, vector<2x8x8xf32> -> vector<2x8x8xf32>
    "tpu.trace_stop"() : () -> ()
    %29 = arith.addf %28, %2 : vector<2x8x8xf32>
    %cst_33 = arith.constant dense<0xFF800000> : vector<2x8xf32>
    %30 = vector.multi_reduction <maximumf>, %29, %cst_33 [2] : vector<2x8x8xf32> to vector<2x8xf32>
    %31 = vector.shape_cast %30 : vector<2x8xf32> to vector<2x8x1xf32>
    %32 = vector.broadcast %31 : vector<2x8x1xf32> to vector<2x8x8xf32>
    %33 = arith.subf %29, %32 : vector<2x8x8xf32>
    %34 = math.exp %33 : vector<2x8x8xf32>
    %cst_34 = arith.constant dense<0.000000e+00> : vector<2x8xf32>
    %35 = vector.multi_reduction <add>, %34, %cst_34 [2] : vector<2x8x8xf32> to vector<2x8xf32>
    %36 = vector.shape_cast %35 : vector<2x8xf32> to vector<2x8x1xf32>
    %37 = tpu.reciprocal %36 {approx = true} : vector<2x8x1xf32> -> vector<2x8x1xf32>
    %38 = vector.broadcast %37 : vector<2x8x1xf32> to vector<2x8x8xf32>
    %39 = arith.mulf %34, %38 : vector<2x8x8xf32>
    "tpu.trace_start"() <{level = 10 : i32, message = "bqk,bkd->bqd"}> : () -> ()
    %cst_35 = arith.constant dense<0.000000e+00> : vector<2x8x16xf32>
    %40 = tpu.matmul %39, %27, %cst_35 {dimension_numbers = #tpu.dot_dimension_numbers<[2], [1], [1], [2], [0, 0, 0, 1, 1, 2], [0], [0]>} : vector<2x8x8xf32>, vector<2x8x16xf32>, vector<2x8x16xf32> -> vector<2x8x16xf32>
    "tpu.trace_stop"() : () -> ()
    %41 = vector.shape_cast %40 : vector<2x8x16xf32> to vector<16x16xf32>
    %c0_36 = arith.constant 0 : index
    %c0_37 = arith.constant 0 : index
    %c0_38 = arith.constant 0 : index
    %c0_39 = arith.constant 0 : index
    %42 = vector.load %arg8[%c0_36, %c0_37, %c0_38, %c0_39] : memref<2x2x16x32xf32, #tpu.memory_space<vmem>>, vector<1x1x16x32xf32>
    %43 = vector.shape_cast %42 : vector<1x1x16x32xf32> to vector<16x32xf32>
    %cst_40 = arith.constant dense<0.000000e+00> : vector<16x32xf32>
    %44 = tpu.matmul %41, %43, %cst_40 {dimension_numbers = #tpu.dot_dimension_numbers<[1], [0], [0], [1], [0, 0, 1, 1], [], []>} : vector<16x16xf32>, vector<16x32xf32>, vector<16x32xf32> -> vector<16x32xf32>
    %45 = arith.addf %3, %44 : vector<16x32xf32>
    %c0_41 = arith.constant 0 : index
    %c1 = arith.constant 1 : index
    %c0_42 = arith.constant 0 : index
    %c0_43 = arith.constant 0 : index
    %46 = vector.load %arg2[%c0_41, %c1, %c0_42, %c0_43] : memref<2x2x32x16xf32, #tpu.memory_space<vmem>>, vector<1x1x32x16xf32>
    %47 = vector.shape_cast %46 : vector<1x1x32x16xf32> to vector<32x16xf32>
    %cst_44 = arith.constant dense<0.000000e+00> : vector<16x16xf32>
    %48 = tpu.matmul %1, %47, %cst_44 {dimension_numbers = #tpu.dot_dimension_numbers<[1], [0], [0], [1], [0, 0, 1, 1], [], []>} : vector<16x32xf32>, vector<32x16xf32>, vector<16x16xf32> -> vector<16x16xf32>
    %c0_45 = arith.constant 0 : index
    %c1_46 = arith.constant 1 : index
    %c0_47 = arith.constant 0 : index
    %c0_48 = arith.constant 0 : index
    %49 = vector.load %arg5[%c0_45, %c1_46, %c0_47, %c0_48] : memref<2x2x1x16xf32, #tpu.memory_space<vmem>>, vector<1x1x1x16xf32>
    %50 = vector.shape_cast %49 : vector<1x1x1x16xf32> to vector<1x16xf32>
    %51 = vector.broadcast %50 : vector<1x16xf32> to vector<16x16xf32>
    %52 = arith.addf %48, %51 : vector<16x16xf32>
    %53 = vector.shape_cast %52 : vector<16x16xf32> to vector<2x8x16xf32>
    %c0_49 = arith.constant 0 : index
    %c1_50 = arith.constant 1 : index
    %c0_51 = arith.constant 0 : index
    %c0_52 = arith.constant 0 : index
    %54 = vector.load %arg3[%c0_49, %c1_50, %c0_51, %c0_52] : memref<2x2x32x16xf32, #tpu.memory_space<vmem>>, vector<1x1x32x16xf32>
    %55 = vector.shape_cast %54 : vector<1x1x32x16xf32> to vector<32x16xf32>
    %cst_53 = arith.constant dense<0.000000e+00> : vector<16x16xf32>
    %56 = tpu.matmul %1, %55, %cst_53 {dimension_numbers = #tpu.dot_dimension_numbers<[1], [0], [0], [1], [0, 0, 1, 1], [], []>} : vector<16x32xf32>, vector<32x16xf32>, vector<16x16xf32> -> vector<16x16xf32>
    %c0_54 = arith.constant 0 : index
    %c1_55 = arith.constant 1 : index
    %c0_56 = arith.constant 0 : index
    %c0_57 = arith.constant 0 : index
    %57 = vector.load %arg6[%c0_54, %c1_55, %c0_56, %c0_57] : memref<2x2x1x16xf32, #tpu.memory_space<vmem>>, vector<1x1x1x16xf32>
    %58 = vector.shape_cast %57 : vector<1x1x1x16xf32> to vector<1x16xf32>
    %59 = vector.broadcast %58 : vector<1x16xf32> to vector<16x16xf32>
    %60 = arith.addf %56, %59 : vector<16x16xf32>
    %61 = vector.shape_cast %60 : vector<16x16xf32> to vector<2x8x16xf32>
    %c0_58 = arith.constant 0 : index
    %c1_59 = arith.constant 1 : index
    %c0_60 = arith.constant 0 : index
    %c0_61 = arith.constant 0 : index
    %62 = vector.load %arg4[%c0_58, %c1_59, %c0_60, %c0_61] : memref<2x2x32x16xf32, #tpu.memory_space<vmem>>, vector<1x1x32x16xf32>
    %63 = vector.shape_cast %62 : vector<1x1x32x16xf32> to vector<32x16xf32>
    %cst_62 = arith.constant dense<0.000000e+00> : vector<16x16xf32>
    %64 = tpu.matmul %1, %63, %cst_62 {dimension_numbers = #tpu.dot_dimension_numbers<[1], [0], [0], [1], [0, 0, 1, 1], [], []>} : vector<16x32xf32>, vector<32x16xf32>, vector<16x16xf32> -> vector<16x16xf32>
    %c0_63 = arith.constant 0 : index
    %c1_64 = arith.constant 1 : index
    %c0_65 = arith.constant 0 : index
    %c0_66 = arith.constant 0 : index
    %65 = vector.load %arg7[%c0_63, %c1_64, %c0_65, %c0_66] : memref<2x2x1x16xf32, #tpu.memory_space<vmem>>, vector<1x1x1x16xf32>
    %66 = vector.shape_cast %65 : vector<1x1x1x16xf32> to vector<1x16xf32>
    %67 = vector.broadcast %66 : vector<1x16xf32> to vector<16x16xf32>
    %68 = arith.addf %64, %67 : vector<16x16xf32>
    %69 = vector.shape_cast %68 : vector<16x16xf32> to vector<2x8x16xf32>
    "tpu.trace_start"() <{level = 10 : i32, message = "bqd,bkd->bqk"}> : () -> ()
    %cst_67 = arith.constant dense<0.000000e+00> : vector<2x8x8xf32>
    %70 = tpu.matmul %53, %61, %cst_67 {dimension_numbers = #tpu.dot_dimension_numbers<[2], [2], [1], [1], [0, 0, 0, 1, 1, 1], [0], [0]>} : vector<2x8x16xf32>, vector<2x8x16xf32>, vector<2x8x8xf32> -> vector<2x8x8xf32>
    "tpu.trace_stop"() : () -> ()
    %71 = arith.addf %70, %2 : vector<2x8x8xf32>
    %cst_68 = arith.constant dense<0xFF800000> : vector<2x8xf32>
    %72 = vector.multi_reduction <maximumf>, %71, %cst_68 [2] : vector<2x8x8xf32> to vector<2x8xf32>
    %73 = vector.shape_cast %72 : vector<2x8xf32> to vector<2x8x1xf32>
    %74 = vector.broadcast %73 : vector<2x8x1xf32> to vector<2x8x8xf32>
    %75 = arith.subf %71, %74 : vector<2x8x8xf32>
    %76 = math.exp %75 : vector<2x8x8xf32>
    %cst_69 = arith.constant dense<0.000000e+00> : vector<2x8xf32>
    %77 = vector.multi_reduction <add>, %76, %cst_69 [2] : vector<2x8x8xf32> to vector<2x8xf32>
    %78 = vector.shape_cast %77 : vector<2x8xf32> to vector<2x8x1xf32>
    %79 = tpu.reciprocal %78 {approx = true} : vector<2x8x1xf32> -> vector<2x8x1xf32>
    %80 = vector.broadcast %79 : vector<2x8x1xf32> to vector<2x8x8xf32>
    %81 = arith.mulf %76, %80 : vector<2x8x8xf32>
    "tpu.trace_start"() <{level = 10 : i32, message = "bqk,bkd->bqd"}> : () -> ()
    %cst_70 = arith.constant dense<0.000000e+00> : vector<2x8x16xf32>
    %82 = tpu.matmul %81, %69, %cst_70 {dimension_numbers = #tpu.dot_dimension_numbers<[2], [1], [1], [2], [0, 0, 0, 1, 1, 2], [0], [0]>} : vector<2x8x8xf32>, vector<2x8x16xf32>, vector<2x8x16xf32> -> vector<2x8x16xf32>
    "tpu.trace_stop"() : () -> ()
    %83 = vector.shape_cast %82 : vector<2x8x16xf32> to vector<16x16xf32>
    %c0_71 = arith.constant 0 : index
    %c1_72 = arith.constant 1 : index
    %c0_73 = arith.constant 0 : index
    %c0_74 = arith.constant 0 : index
    %84 = vector.load %arg8[%c0_71, %c1_72, %c0_73, %c0_74] : memref<2x2x16x32xf32, #tpu.memory_space<vmem>>, vector<1x1x16x32xf32>
    %85 = vector.shape_cast %84 : vector<1x1x16x32xf32> to vector<16x32xf32>
    %cst_75 = arith.constant dense<0.000000e+00> : vector<16x32xf32>
    %86 = tpu.matmul %83, %85, %cst_75 {dimension_numbers = #tpu.dot_dimension_numbers<[1], [0], [0], [1], [0, 0, 1, 1], [], []>} : vector<16x16xf32>, vector<16x32xf32>, vector<16x32xf32> -> vector<16x32xf32>
    %87 = arith.addf %45, %86 : vector<16x32xf32>
    %c0_76 = arith.constant 0 : index
    %c0_77 = arith.constant 0 : index
    %c0_78 = arith.constant 0 : index
    %88 = vector.load %arg9[%c0_76, %c0_77, %c0_78] : memref<2x1x32xf32, #tpu.memory_space<vmem>>, vector<1x1x32xf32>
    %89 = vector.shape_cast %88 : vector<1x1x32xf32> to vector<1x32xf32>
    %90 = vector.broadcast %89 : vector<1x32xf32> to vector<16x32xf32>
    %91 = arith.addf %87, %90 : vector<16x32xf32>
    %92 = arith.addf %1, %91 : vector<16x32xf32>
    %c0_79 = arith.constant 0 : index
    %c0_80 = arith.constant 0 : index
    %c0_81 = arith.constant 0 : index
    %93 = vector.load %arg10[%c0_79, %c0_80, %c0_81] : memref<2x1x32xf32, #tpu.memory_space<vmem>>, vector<1x1x32xf32>
    %94 = vector.shape_cast %93 : vector<1x1x32xf32> to vector<1x32xf32>
    %c0_82 = arith.constant 0 : index
    %c0_83 = arith.constant 0 : index
    %c0_84 = arith.constant 0 : index
    %95 = vector.load %arg11[%c0_82, %c0_83, %c0_84] : memref<2x1x32xf32, #tpu.memory_space<vmem>>, vector<1x1x32xf32>
    %96 = vector.shape_cast %95 : vector<1x1x32xf32> to vector<1x32xf32>
    %cst_85 = arith.constant dense<0.000000e+00> : vector<16xf32>
    %97 = vector.multi_reduction <add>, %92, %cst_85 [1] : vector<16x32xf32> to vector<16xf32>
    %98 = vector.shape_cast %97 : vector<16xf32> to vector<16x1xf32>
    %cst_86 = arith.constant 3.200000e+01 : f32
    %99 = vector.broadcast %cst_86 : f32 to vector<16x1xf32>
    %100 = arith.divf %98, %99 : vector<16x1xf32>
    %101 = vector.broadcast %100 : vector<16x1xf32> to vector<16x32xf32>
    %102 = arith.subf %92, %101 : vector<16x32xf32>
    %103 = arith.mulf %102, %102 : vector<16x32xf32>
    %cst_87 = arith.constant dense<0.000000e+00> : vector<16xf32>
    %104 = vector.multi_reduction <add>, %103, %cst_87 [1] : vector<16x32xf32> to vector<16xf32>
    %105 = vector.shape_cast %104 : vector<16xf32> to vector<16x1xf32>
    %cst_88 = arith.constant 3.200000e+01 : f32
    %106 = vector.broadcast %cst_88 : f32 to vector<16x1xf32>
    %107 = arith.divf %105, %106 : vector<16x1xf32>
    %108 = vector.broadcast %100 : vector<16x1xf32> to vector<16x32xf32>
    %109 = arith.subf %92, %108 : vector<16x32xf32>
    %cst_89 = arith.constant 9.99999974E-6 : f32
    %110 = vector.broadcast %cst_89 : f32 to vector<16x1xf32>
    %111 = arith.addf %107, %110 : vector<16x1xf32>
    %112 = math.rsqrt %111 : vector<16x1xf32>
    %113 = vector.broadcast %112 : vector<16x1xf32> to vector<16x32xf32>
    %114 = arith.mulf %109, %113 : vector<16x32xf32>
    %115 = vector.broadcast %94 : vector<1x32xf32> to vector<16x32xf32>
    %116 = arith.mulf %114, %115 : vector<16x32xf32>
    %117 = vector.broadcast %96 : vector<1x32xf32> to vector<16x32xf32>
    %118 = arith.addf %116, %117 : vector<16x32xf32>
    %c0_90 = arith.constant 0 : index
    %c0_91 = arith.constant 0 : index
    %c0_92 = arith.constant 0 : index
    %119 = vector.load %arg12[%c0_90, %c0_91, %c0_92] : memref<2x32x128xf32, #tpu.memory_space<vmem>>, vector<1x32x128xf32>
    %120 = vector.shape_cast %119 : vector<1x32x128xf32> to vector<32x128xf32>
    %cst_93 = arith.constant dense<0.000000e+00> : vector<16x128xf32>
    %121 = tpu.matmul %118, %120, %cst_93 {dimension_numbers = #tpu.dot_dimension_numbers<[1], [0], [0], [1], [0, 0, 1, 1], [], []>} : vector<16x32xf32>, vector<32x128xf32>, vector<16x128xf32> -> vector<16x128xf32>
    %c0_94 = arith.constant 0 : index
    %c0_95 = arith.constant 0 : index
    %c0_96 = arith.constant 0 : index
    %122 = vector.load %arg13[%c0_94, %c0_95, %c0_96] : memref<2x1x128xf32, #tpu.memory_space<vmem>>, vector<1x1x128xf32>
    %123 = vector.shape_cast %122 : vector<1x1x128xf32> to vector<1x128xf32>
    %124 = vector.broadcast %123 : vector<1x128xf32> to vector<16x128xf32>
    %125 = arith.addf %121, %124 : vector<16x128xf32>
    %126 = arith.mulf %125, %125 : vector<16x128xf32>
    %127 = arith.mulf %125, %126 : vector<16x128xf32>
    %cst_97 = arith.constant 4.471500e-02 : f32
    %128 = vector.broadcast %cst_97 : f32 to vector<16x128xf32>
    %129 = arith.mulf %128, %127 : vector<16x128xf32>
    %130 = arith.addf %125, %129 : vector<16x128xf32>
    %cst_98 = arith.constant 0.797884583 : f32
    %131 = vector.broadcast %cst_98 : f32 to vector<16x128xf32>
    %132 = arith.mulf %131, %130 : vector<16x128xf32>
    %133 = math.tanh %132 : vector<16x128xf32>
    %cst_99 = arith.constant 1.000000e+00 : f32
    %134 = vector.broadcast %cst_99 : f32 to vector<16x128xf32>
    %135 = arith.addf %134, %133 : vector<16x128xf32>
    %cst_100 = arith.constant 5.000000e-01 : f32
    %136 = vector.broadcast %cst_100 : f32 to vector<16x128xf32>
    %137 = arith.mulf %136, %135 : vector<16x128xf32>
    %138 = arith.mulf %125, %137 : vector<16x128xf32>
    %c0_101 = arith.constant 0 : index
    %c0_102 = arith.constant 0 : index
    %c0_103 = arith.constant 0 : index
    %139 = vector.load %arg14[%c0_101, %c0_102, %c0_103] : memref<2x128x32xf32, #tpu.memory_space<vmem>>, vector<1x128x32xf32>
    %140 = vector.shape_cast %139 : vector<1x128x32xf32> to vector<128x32xf32>
    %cst_104 = arith.constant dense<0.000000e+00> : vector<16x32xf32>
    %141 = tpu.matmul %138, %140, %cst_104 {dimension_numbers = #tpu.dot_dimension_numbers<[1], [0], [0], [1], [0, 0, 1, 1], [], []>} : vector<16x128xf32>, vector<128x32xf32>, vector<16x32xf32> -> vector<16x32xf32>
    %c0_105 = arith.constant 0 : index
    %c0_106 = arith.constant 0 : index
    %c0_107 = arith.constant 0 : index
    %142 = vector.load %arg15[%c0_105, %c0_106, %c0_107] : memref<2x1x32xf32, #tpu.memory_space<vmem>>, vector<1x1x32xf32>
    %143 = vector.shape_cast %142 : vector<1x1x32xf32> to vector<1x32xf32>
    %144 = vector.broadcast %143 : vector<1x32xf32> to vector<16x32xf32>
    %145 = arith.addf %141, %144 : vector<16x32xf32>
    %146 = arith.addf %118, %145 : vector<16x32xf32>
    %c0_108 = arith.constant 0 : index
    %c0_109 = arith.constant 0 : index
    %c0_110 = arith.constant 0 : index
    %147 = vector.load %arg16[%c0_108, %c0_109, %c0_110] : memref<2x1x32xf32, #tpu.memory_space<vmem>>, vector<1x1x32xf32>
    %148 = vector.shape_cast %147 : vector<1x1x32xf32> to vector<1x32xf32>
    %c0_111 = arith.constant 0 : index
    %c0_112 = arith.constant 0 : index
    %c0_113 = arith.constant 0 : index
    %149 = vector.load %arg17[%c0_111, %c0_112, %c0_113] : memref<2x1x32xf32, #tpu.memory_space<vmem>>, vector<1x1x32xf32>
    %150 = vector.shape_cast %149 : vector<1x1x32xf32> to vector<1x32xf32>
    %cst_114 = arith.constant dense<0.000000e+00> : vector<16xf32>
    %151 = vector.multi_reduction <add>, %146, %cst_114 [1] : vector<16x32xf32> to vector<16xf32>
    %152 = vector.shape_cast %151 : vector<16xf32> to vector<16x1xf32>
    %cst_115 = arith.constant 3.200000e+01 : f32
    %153 = vector.broadcast %cst_115 : f32 to vector<16x1xf32>
    %154 = arith.divf %152, %153 : vector<16x1xf32>
    %155 = vector.broadcast %154 : vector<16x1xf32> to vector<16x32xf32>
    %156 = arith.subf %146, %155 : vector<16x32xf32>
    %157 = arith.mulf %156, %156 : vector<16x32xf32>
    %cst_116 = arith.constant dense<0.000000e+00> : vector<16xf32>
    %158 = vector.multi_reduction <add>, %157, %cst_116 [1] : vector<16x32xf32> to vector<16xf32>
    %159 = vector.shape_cast %158 : vector<16xf32> to vector<16x1xf32>
    %cst_117 = arith.constant 3.200000e+01 : f32
    %160 = vector.broadcast %cst_117 : f32 to vector<16x1xf32>
    %161 = arith.divf %159, %160 : vector<16x1xf32>
    %162 = vector.broadcast %154 : vector<16x1xf32> to vector<16x32xf32>
    %163 = arith.subf %146, %162 : vector<16x32xf32>
    %cst_118 = arith.constant 9.99999974E-6 : f32
    %164 = vector.broadcast %cst_118 : f32 to vector<16x1xf32>
    %165 = arith.addf %161, %164 : vector<16x1xf32>
    %166 = math.rsqrt %165 : vector<16x1xf32>
    %167 = vector.broadcast %166 : vector<16x1xf32> to vector<16x32xf32>
    %168 = arith.mulf %163, %167 : vector<16x32xf32>
    %169 = vector.broadcast %148 : vector<1x32xf32> to vector<16x32xf32>
    %170 = arith.mulf %168, %169 : vector<16x32xf32>
    %171 = vector.broadcast %150 : vector<1x32xf32> to vector<16x32xf32>
    %172 = arith.addf %170, %171 : vector<16x32xf32>
    %cst_119 = arith.constant 0.000000e+00 : f32
    %173 = vector.broadcast %cst_119 : f32 to vector<16x32xf32>
    %c1_120 = arith.constant 1 : index
    %c0_121 = arith.constant 0 : index
    %c0_122 = arith.constant 0 : index
    %c0_123 = arith.constant 0 : index
    %174 = vector.load %arg2[%c1_120, %c0_121, %c0_122, %c0_123] : memref<2x2x32x16xf32, #tpu.memory_space<vmem>>, vector<1x1x32x16xf32>
    %175 = vector.shape_cast %174 : vector<1x1x32x16xf32> to vector<32x16xf32>
    %cst_124 = arith.constant dense<0.000000e+00> : vector<16x16xf32>
    %176 = tpu.matmul %172, %175, %cst_124 {dimension_numbers = #tpu.dot_dimension_numbers<[1], [0], [0], [1], [0, 0, 1, 1], [], []>} : vector<16x32xf32>, vector<32x16xf32>, vector<16x16xf32> -> vector<16x16xf32>
    %c1_125 = arith.constant 1 : index
    %c0_126 = arith.constant 0 : index
    %c0_127 = arith.constant 0 : index
    %c0_128 = arith.constant 0 : index
    %177 = vector.load %arg5[%c1_125, %c0_126, %c0_127, %c0_128] : memref<2x2x1x16xf32, #tpu.memory_space<vmem>>, vector<1x1x1x16xf32>
    %178 = vector.shape_cast %177 : vector<1x1x1x16xf32> to vector<1x16xf32>
    %179 = vector.broadcast %178 : vector<1x16xf32> to vector<16x16xf32>
    %180 = arith.addf %176, %179 : vector<16x16xf32>
    %181 = vector.shape_cast %180 : vector<16x16xf32> to vector<2x8x16xf32>
    %c1_129 = arith.constant 1 : index
    %c0_130 = arith.constant 0 : index
    %c0_131 = arith.constant 0 : index
    %c0_132 = arith.constant 0 : index
    %182 = vector.load %arg3[%c1_129, %c0_130, %c0_131, %c0_132] : memref<2x2x32x16xf32, #tpu.memory_space<vmem>>, vector<1x1x32x16xf32>
    %183 = vector.shape_cast %182 : vector<1x1x32x16xf32> to vector<32x16xf32>
    %cst_133 = arith.constant dense<0.000000e+00> : vector<16x16xf32>
    %184 = tpu.matmul %172, %183, %cst_133 {dimension_numbers = #tpu.dot_dimension_numbers<[1], [0], [0], [1], [0, 0, 1, 1], [], []>} : vector<16x32xf32>, vector<32x16xf32>, vector<16x16xf32> -> vector<16x16xf32>
    %c1_134 = arith.constant 1 : index
    %c0_135 = arith.constant 0 : index
    %c0_136 = arith.constant 0 : index
    %c0_137 = arith.constant 0 : index
    %185 = vector.load %arg6[%c1_134, %c0_135, %c0_136, %c0_137] : memref<2x2x1x16xf32, #tpu.memory_space<vmem>>, vector<1x1x1x16xf32>
    %186 = vector.shape_cast %185 : vector<1x1x1x16xf32> to vector<1x16xf32>
    %187 = vector.broadcast %186 : vector<1x16xf32> to vector<16x16xf32>
    %188 = arith.addf %184, %187 : vector<16x16xf32>
    %189 = vector.shape_cast %188 : vector<16x16xf32> to vector<2x8x16xf32>
    %c1_138 = arith.constant 1 : index
    %c0_139 = arith.constant 0 : index
    %c0_140 = arith.constant 0 : index
    %c0_141 = arith.constant 0 : index
    %190 = vector.load %arg4[%c1_138, %c0_139, %c0_140, %c0_141] : memref<2x2x32x16xf32, #tpu.memory_space<vmem>>, vector<1x1x32x16xf32>
    %191 = vector.shape_cast %190 : vector<1x1x32x16xf32> to vector<32x16xf32>
    %cst_142 = arith.constant dense<0.000000e+00> : vector<16x16xf32>
    %192 = tpu.matmul %172, %191, %cst_142 {dimension_numbers = #tpu.dot_dimension_numbers<[1], [0], [0], [1], [0, 0, 1, 1], [], []>} : vector<16x32xf32>, vector<32x16xf32>, vector<16x16xf32> -> vector<16x16xf32>
    %c1_143 = arith.constant 1 : index
    %c0_144 = arith.constant 0 : index
    %c0_145 = arith.constant 0 : index
    %c0_146 = arith.constant 0 : index
    %193 = vector.load %arg7[%c1_143, %c0_144, %c0_145, %c0_146] : memref<2x2x1x16xf32, #tpu.memory_space<vmem>>, vector<1x1x1x16xf32>
    %194 = vector.shape_cast %193 : vector<1x1x1x16xf32> to vector<1x16xf32>
    %195 = vector.broadcast %194 : vector<1x16xf32> to vector<16x16xf32>
    %196 = arith.addf %192, %195 : vector<16x16xf32>
    %197 = vector.shape_cast %196 : vector<16x16xf32> to vector<2x8x16xf32>
    "tpu.trace_start"() <{level = 10 : i32, message = "bqd,bkd->bqk"}> : () -> ()
    %cst_147 = arith.constant dense<0.000000e+00> : vector<2x8x8xf32>
    %198 = tpu.matmul %181, %189, %cst_147 {dimension_numbers = #tpu.dot_dimension_numbers<[2], [2], [1], [1], [0, 0, 0, 1, 1, 1], [0], [0]>} : vector<2x8x16xf32>, vector<2x8x16xf32>, vector<2x8x8xf32> -> vector<2x8x8xf32>
    "tpu.trace_stop"() : () -> ()
    %199 = arith.addf %198, %2 : vector<2x8x8xf32>
    %cst_148 = arith.constant dense<0xFF800000> : vector<2x8xf32>
    %200 = vector.multi_reduction <maximumf>, %199, %cst_148 [2] : vector<2x8x8xf32> to vector<2x8xf32>
    %201 = vector.shape_cast %200 : vector<2x8xf32> to vector<2x8x1xf32>
    %202 = vector.broadcast %201 : vector<2x8x1xf32> to vector<2x8x8xf32>
    %203 = arith.subf %199, %202 : vector<2x8x8xf32>
    %204 = math.exp %203 : vector<2x8x8xf32>
    %cst_149 = arith.constant dense<0.000000e+00> : vector<2x8xf32>
    %205 = vector.multi_reduction <add>, %204, %cst_149 [2] : vector<2x8x8xf32> to vector<2x8xf32>
    %206 = vector.shape_cast %205 : vector<2x8xf32> to vector<2x8x1xf32>
    %207 = tpu.reciprocal %206 {approx = true} : vector<2x8x1xf32> -> vector<2x8x1xf32>
    %208 = vector.broadcast %207 : vector<2x8x1xf32> to vector<2x8x8xf32>
    %209 = arith.mulf %204, %208 : vector<2x8x8xf32>
    "tpu.trace_start"() <{level = 10 : i32, message = "bqk,bkd->bqd"}> : () -> ()
    %cst_150 = arith.constant dense<0.000000e+00> : vector<2x8x16xf32>
    %210 = tpu.matmul %209, %197, %cst_150 {dimension_numbers = #tpu.dot_dimension_numbers<[2], [1], [1], [2], [0, 0, 0, 1, 1, 2], [0], [0]>} : vector<2x8x8xf32>, vector<2x8x16xf32>, vector<2x8x16xf32> -> vector<2x8x16xf32>
    "tpu.trace_stop"() : () -> ()
    %211 = vector.shape_cast %210 : vector<2x8x16xf32> to vector<16x16xf32>
    %c1_151 = arith.constant 1 : index
    %c0_152 = arith.constant 0 : index
    %c0_153 = arith.constant 0 : index
    %c0_154 = arith.constant 0 : index
    %212 = vector.load %arg8[%c1_151, %c0_152, %c0_153, %c0_154] : memref<2x2x16x32xf32, #tpu.memory_space<vmem>>, vector<1x1x16x32xf32>
    %213 = vector.shape_cast %212 : vector<1x1x16x32xf32> to vector<16x32xf32>
    %cst_155 = arith.constant dense<0.000000e+00> : vector<16x32xf32>
    %214 = tpu.matmul %211, %213, %cst_155 {dimension_numbers = #tpu.dot_dimension_numbers<[1], [0], [0], [1], [0, 0, 1, 1], [], []>} : vector<16x16xf32>, vector<16x32xf32>, vector<16x32xf32> -> vector<16x32xf32>
    %215 = arith.addf %173, %214 : vector<16x32xf32>
    %c1_156 = arith.constant 1 : index
    %c1_157 = arith.constant 1 : index
    %c0_158 = arith.constant 0 : index
    %c0_159 = arith.constant 0 : index
    %216 = vector.load %arg2[%c1_156, %c1_157, %c0_158, %c0_159] : memref<2x2x32x16xf32, #tpu.memory_space<vmem>>, vector<1x1x32x16xf32>
    %217 = vector.shape_cast %216 : vector<1x1x32x16xf32> to vector<32x16xf32>
    %cst_160 = arith.constant dense<0.000000e+00> : vector<16x16xf32>
    %218 = tpu.matmul %172, %217, %cst_160 {dimension_numbers = #tpu.dot_dimension_numbers<[1], [0], [0], [1], [0, 0, 1, 1], [], []>} : vector<16x32xf32>, vector<32x16xf32>, vector<16x16xf32> -> vector<16x16xf32>
    %c1_161 = arith.constant 1 : index
    %c1_162 = arith.constant 1 : index
    %c0_163 = arith.constant 0 : index
    %c0_164 = arith.constant 0 : index
    %219 = vector.load %arg5[%c1_161, %c1_162, %c0_163, %c0_164] : memref<2x2x1x16xf32, #tpu.memory_space<vmem>>, vector<1x1x1x16xf32>
    %220 = vector.shape_cast %219 : vector<1x1x1x16xf32> to vector<1x16xf32>
    %221 = vector.broadcast %220 : vector<1x16xf32> to vector<16x16xf32>
    %222 = arith.addf %218, %221 : vector<16x16xf32>
    %223 = vector.shape_cast %222 : vector<16x16xf32> to vector<2x8x16xf32>
    %c1_165 = arith.constant 1 : index
    %c1_166 = arith.constant 1 : index
    %c0_167 = arith.constant 0 : index
    %c0_168 = arith.constant 0 : index
    %224 = vector.load %arg3[%c1_165, %c1_166, %c0_167, %c0_168] : memref<2x2x32x16xf32, #tpu.memory_space<vmem>>, vector<1x1x32x16xf32>
    %225 = vector.shape_cast %224 : vector<1x1x32x16xf32> to vector<32x16xf32>
    %cst_169 = arith.constant dense<0.000000e+00> : vector<16x16xf32>
    %226 = tpu.matmul %172, %225, %cst_169 {dimension_numbers = #tpu.dot_dimension_numbers<[1], [0], [0], [1], [0, 0, 1, 1], [], []>} : vector<16x32xf32>, vector<32x16xf32>, vector<16x16xf32> -> vector<16x16xf32>
    %c1_170 = arith.constant 1 : index
    %c1_171 = arith.constant 1 : index
    %c0_172 = arith.constant 0 : index
    %c0_173 = arith.constant 0 : index
    %227 = vector.load %arg6[%c1_170, %c1_171, %c0_172, %c0_173] : memref<2x2x1x16xf32, #tpu.memory_space<vmem>>, vector<1x1x1x16xf32>
    %228 = vector.shape_cast %227 : vector<1x1x1x16xf32> to vector<1x16xf32>
    %229 = vector.broadcast %228 : vector<1x16xf32> to vector<16x16xf32>
    %230 = arith.addf %226, %229 : vector<16x16xf32>
    %231 = vector.shape_cast %230 : vector<16x16xf32> to vector<2x8x16xf32>
    %c1_174 = arith.constant 1 : index
    %c1_175 = arith.constant 1 : index
    %c0_176 = arith.constant 0 : index
    %c0_177 = arith.constant 0 : index
    %232 = vector.load %arg4[%c1_174, %c1_175, %c0_176, %c0_177] : memref<2x2x32x16xf32, #tpu.memory_space<vmem>>, vector<1x1x32x16xf32>
    %233 = vector.shape_cast %232 : vector<1x1x32x16xf32> to vector<32x16xf32>
    %cst_178 = arith.constant dense<0.000000e+00> : vector<16x16xf32>
    %234 = tpu.matmul %172, %233, %cst_178 {dimension_numbers = #tpu.dot_dimension_numbers<[1], [0], [0], [1], [0, 0, 1, 1], [], []>} : vector<16x32xf32>, vector<32x16xf32>, vector<16x16xf32> -> vector<16x16xf32>
    %c1_179 = arith.constant 1 : index
    %c1_180 = arith.constant 1 : index
    %c0_181 = arith.constant 0 : index
    %c0_182 = arith.constant 0 : index
    %235 = vector.load %arg7[%c1_179, %c1_180, %c0_181, %c0_182] : memref<2x2x1x16xf32, #tpu.memory_space<vmem>>, vector<1x1x1x16xf32>
    %236 = vector.shape_cast %235 : vector<1x1x1x16xf32> to vector<1x16xf32>
    %237 = vector.broadcast %236 : vector<1x16xf32> to vector<16x16xf32>
    %238 = arith.addf %234, %237 : vector<16x16xf32>
    %239 = vector.shape_cast %238 : vector<16x16xf32> to vector<2x8x16xf32>
    "tpu.trace_start"() <{level = 10 : i32, message = "bqd,bkd->bqk"}> : () -> ()
    %cst_183 = arith.constant dense<0.000000e+00> : vector<2x8x8xf32>
    %240 = tpu.matmul %223, %231, %cst_183 {dimension_numbers = #tpu.dot_dimension_numbers<[2], [2], [1], [1], [0, 0, 0, 1, 1, 1], [0], [0]>} : vector<2x8x16xf32>, vector<2x8x16xf32>, vector<2x8x8xf32> -> vector<2x8x8xf32>
    "tpu.trace_stop"() : () -> ()
    %241 = arith.addf %240, %2 : vector<2x8x8xf32>
    %cst_184 = arith.constant dense<0xFF800000> : vector<2x8xf32>
    %242 = vector.multi_reduction <maximumf>, %241, %cst_184 [2] : vector<2x8x8xf32> to vector<2x8xf32>
    %243 = vector.shape_cast %242 : vector<2x8xf32> to vector<2x8x1xf32>
    %244 = vector.broadcast %243 : vector<2x8x1xf32> to vector<2x8x8xf32>
    %245 = arith.subf %241, %244 : vector<2x8x8xf32>
    %246 = math.exp %245 : vector<2x8x8xf32>
    %cst_185 = arith.constant dense<0.000000e+00> : vector<2x8xf32>
    %247 = vector.multi_reduction <add>, %246, %cst_185 [2] : vector<2x8x8xf32> to vector<2x8xf32>
    %248 = vector.shape_cast %247 : vector<2x8xf32> to vector<2x8x1xf32>
    %249 = tpu.reciprocal %248 {approx = true} : vector<2x8x1xf32> -> vector<2x8x1xf32>
    %250 = vector.broadcast %249 : vector<2x8x1xf32> to vector<2x8x8xf32>
    %251 = arith.mulf %246, %250 : vector<2x8x8xf32>
    "tpu.trace_start"() <{level = 10 : i32, message = "bqk,bkd->bqd"}> : () -> ()
    %cst_186 = arith.constant dense<0.000000e+00> : vector<2x8x16xf32>
    %252 = tpu.matmul %251, %239, %cst_186 {dimension_numbers = #tpu.dot_dimension_numbers<[2], [1], [1], [2], [0, 0, 0, 1, 1, 2], [0], [0]>} : vector<2x8x8xf32>, vector<2x8x16xf32>, vector<2x8x16xf32> -> vector<2x8x16xf32>
    "tpu.trace_stop"() : () -> ()
    %253 = vector.shape_cast %252 : vector<2x8x16xf32> to vector<16x16xf32>
    %c1_187 = arith.constant 1 : index
    %c1_188 = arith.constant 1 : index
    %c0_189 = arith.constant 0 : index
    %c0_190 = arith.constant 0 : index
    %254 = vector.load %arg8[%c1_187, %c1_188, %c0_189, %c0_190] : memref<2x2x16x32xf32, #tpu.memory_space<vmem>>, vector<1x1x16x32xf32>
    %255 = vector.shape_cast %254 : vector<1x1x16x32xf32> to vector<16x32xf32>
    %cst_191 = arith.constant dense<0.000000e+00> : vector<16x32xf32>
    %256 = tpu.matmul %253, %255, %cst_191 {dimension_numbers = #tpu.dot_dimension_numbers<[1], [0], [0], [1], [0, 0, 1, 1], [], []>} : vector<16x16xf32>, vector<16x32xf32>, vector<16x32xf32> -> vector<16x32xf32>
    %257 = arith.addf %215, %256 : vector<16x32xf32>
    %c1_192 = arith.constant 1 : index
    %c0_193 = arith.constant 0 : index
    %c0_194 = arith.constant 0 : index
    %258 = vector.load %arg9[%c1_192, %c0_193, %c0_194] : memref<2x1x32xf32, #tpu.memory_space<vmem>>, vector<1x1x32xf32>
    %259 = vector.shape_cast %258 : vector<1x1x32xf32> to vector<1x32xf32>
    %260 = vector.broadcast %259 : vector<1x32xf32> to vector<16x32xf32>
    %261 = arith.addf %257, %260 : vector<16x32xf32>
    %262 = arith.addf %172, %261 : vector<16x32xf32>
    %c1_195 = arith.constant 1 : index
    %c0_196 = arith.constant 0 : index
    %c0_197 = arith.constant 0 : index
    %263 = vector.load %arg10[%c1_195, %c0_196, %c0_197] : memref<2x1x32xf32, #tpu.memory_space<vmem>>, vector<1x1x32xf32>
    %264 = vector.shape_cast %263 : vector<1x1x32xf32> to vector<1x32xf32>
    %c1_198 = arith.constant 1 : index
    %c0_199 = arith.constant 0 : index
    %c0_200 = arith.constant 0 : index
    %265 = vector.load %arg11[%c1_198, %c0_199, %c0_200] : memref<2x1x32xf32, #tpu.memory_space<vmem>>, vector<1x1x32xf32>
    %266 = vector.shape_cast %265 : vector<1x1x32xf32> to vector<1x32xf32>
    %cst_201 = arith.constant dense<0.000000e+00> : vector<16xf32>
    %267 = vector.multi_reduction <add>, %262, %cst_201 [1] : vector<16x32xf32> to vector<16xf32>
    %268 = vector.shape_cast %267 : vector<16xf32> to vector<16x1xf32>
    %cst_202 = arith.constant 3.200000e+01 : f32
    %269 = vector.broadcast %cst_202 : f32 to vector<16x1xf32>
    %270 = arith.divf %268, %269 : vector<16x1xf32>
    %271 = vector.broadcast %270 : vector<16x1xf32> to vector<16x32xf32>
    %272 = arith.subf %262, %271 : vector<16x32xf32>
    %273 = arith.mulf %272, %272 : vector<16x32xf32>
    %cst_203 = arith.constant dense<0.000000e+00> : vector<16xf32>
    %274 = vector.multi_reduction <add>, %273, %cst_203 [1] : vector<16x32xf32> to vector<16xf32>
    %275 = vector.shape_cast %274 : vector<16xf32> to vector<16x1xf32>
    %cst_204 = arith.constant 3.200000e+01 : f32
    %276 = vector.broadcast %cst_204 : f32 to vector<16x1xf32>
    %277 = arith.divf %275, %276 : vector<16x1xf32>
    %278 = vector.broadcast %270 : vector<16x1xf32> to vector<16x32xf32>
    %279 = arith.subf %262, %278 : vector<16x32xf32>
    %cst_205 = arith.constant 9.99999974E-6 : f32
    %280 = vector.broadcast %cst_205 : f32 to vector<16x1xf32>
    %281 = arith.addf %277, %280 : vector<16x1xf32>
    %282 = math.rsqrt %281 : vector<16x1xf32>
    %283 = vector.broadcast %282 : vector<16x1xf32> to vector<16x32xf32>
    %284 = arith.mulf %279, %283 : vector<16x32xf32>
    %285 = vector.broadcast %264 : vector<1x32xf32> to vector<16x32xf32>
    %286 = arith.mulf %284, %285 : vector<16x32xf32>
    %287 = vector.broadcast %266 : vector<1x32xf32> to vector<16x32xf32>
    %288 = arith.addf %286, %287 : vector<16x32xf32>
    %c1_206 = arith.constant 1 : index
    %c0_207 = arith.constant 0 : index
    %c0_208 = arith.constant 0 : index
    %289 = vector.load %arg12[%c1_206, %c0_207, %c0_208] : memref<2x32x128xf32, #tpu.memory_space<vmem>>, vector<1x32x128xf32>
    %290 = vector.shape_cast %289 : vector<1x32x128xf32> to vector<32x128xf32>
    %cst_209 = arith.constant dense<0.000000e+00> : vector<16x128xf32>
    %291 = tpu.matmul %288, %290, %cst_209 {dimension_numbers = #tpu.dot_dimension_numbers<[1], [0], [0], [1], [0, 0, 1, 1], [], []>} : vector<16x32xf32>, vector<32x128xf32>, vector<16x128xf32> -> vector<16x128xf32>
    %c1_210 = arith.constant 1 : index
    %c0_211 = arith.constant 0 : index
    %c0_212 = arith.constant 0 : index
    %292 = vector.load %arg13[%c1_210, %c0_211, %c0_212] : memref<2x1x128xf32, #tpu.memory_space<vmem>>, vector<1x1x128xf32>
    %293 = vector.shape_cast %292 : vector<1x1x128xf32> to vector<1x128xf32>
    %294 = vector.broadcast %293 : vector<1x128xf32> to vector<16x128xf32>
    %295 = arith.addf %291, %294 : vector<16x128xf32>
    %296 = arith.mulf %295, %295 : vector<16x128xf32>
    %297 = arith.mulf %295, %296 : vector<16x128xf32>
    %cst_213 = arith.constant 4.471500e-02 : f32
    %298 = vector.broadcast %cst_213 : f32 to vector<16x128xf32>
    %299 = arith.mulf %298, %297 : vector<16x128xf32>
    %300 = arith.addf %295, %299 : vector<16x128xf32>
    %cst_214 = arith.constant 0.797884583 : f32
    %301 = vector.broadcast %cst_214 : f32 to vector<16x128xf32>
    %302 = arith.mulf %301, %300 : vector<16x128xf32>
    %303 = math.tanh %302 : vector<16x128xf32>
    %cst_215 = arith.constant 1.000000e+00 : f32
    %304 = vector.broadcast %cst_215 : f32 to vector<16x128xf32>
    %305 = arith.addf %304, %303 : vector<16x128xf32>
    %cst_216 = arith.constant 5.000000e-01 : f32
    %306 = vector.broadcast %cst_216 : f32 to vector<16x128xf32>
    %307 = arith.mulf %306, %305 : vector<16x128xf32>
    %308 = arith.mulf %295, %307 : vector<16x128xf32>
    %c1_217 = arith.constant 1 : index
    %c0_218 = arith.constant 0 : index
    %c0_219 = arith.constant 0 : index
    %309 = vector.load %arg14[%c1_217, %c0_218, %c0_219] : memref<2x128x32xf32, #tpu.memory_space<vmem>>, vector<1x128x32xf32>
    %310 = vector.shape_cast %309 : vector<1x128x32xf32> to vector<128x32xf32>
    %cst_220 = arith.constant dense<0.000000e+00> : vector<16x32xf32>
    %311 = tpu.matmul %308, %310, %cst_220 {dimension_numbers = #tpu.dot_dimension_numbers<[1], [0], [0], [1], [0, 0, 1, 1], [], []>} : vector<16x128xf32>, vector<128x32xf32>, vector<16x32xf32> -> vector<16x32xf32>
    %c1_221 = arith.constant 1 : index
    %c0_222 = arith.constant 0 : index
    %c0_223 = arith.constant 0 : index
    %312 = vector.load %arg15[%c1_221, %c0_222, %c0_223] : memref<2x1x32xf32, #tpu.memory_space<vmem>>, vector<1x1x32xf32>
    %313 = vector.shape_cast %312 : vector<1x1x32xf32> to vector<1x32xf32>
    %314 = vector.broadcast %313 : vector<1x32xf32> to vector<16x32xf32>
    %315 = arith.addf %311, %314 : vector<16x32xf32>
    %316 = arith.addf %288, %315 : vector<16x32xf32>
    %c1_224 = arith.constant 1 : index
    %c0_225 = arith.constant 0 : index
    %c0_226 = arith.constant 0 : index
    %317 = vector.load %arg16[%c1_224, %c0_225, %c0_226] : memref<2x1x32xf32, #tpu.memory_space<vmem>>, vector<1x1x32xf32>
    %318 = vector.shape_cast %317 : vector<1x1x32xf32> to vector<1x32xf32>
    %c1_227 = arith.constant 1 : index
    %c0_228 = arith.constant 0 : index
    %c0_229 = arith.constant 0 : index
    %319 = vector.load %arg17[%c1_227, %c0_228, %c0_229] : memref<2x1x32xf32, #tpu.memory_space<vmem>>, vector<1x1x32xf32>
    %320 = vector.shape_cast %319 : vector<1x1x32xf32> to vector<1x32xf32>
    %cst_230 = arith.constant dense<0.000000e+00> : vector<16xf32>
    %321 = vector.multi_reduction <add>, %316, %cst_230 [1] : vector<16x32xf32> to vector<16xf32>
    %322 = vector.shape_cast %321 : vector<16xf32> to vector<16x1xf32>
    %cst_231 = arith.constant 3.200000e+01 : f32
    %323 = vector.broadcast %cst_231 : f32 to vector<16x1xf32>
    %324 = arith.divf %322, %323 : vector<16x1xf32>
    %325 = vector.broadcast %324 : vector<16x1xf32> to vector<16x32xf32>
    %326 = arith.subf %316, %325 : vector<16x32xf32>
    %327 = arith.mulf %326, %326 : vector<16x32xf32>
    %cst_232 = arith.constant dense<0.000000e+00> : vector<16xf32>
    %328 = vector.multi_reduction <add>, %327, %cst_232 [1] : vector<16x32xf32> to vector<16xf32>
    %329 = vector.shape_cast %328 : vector<16xf32> to vector<16x1xf32>
    %cst_233 = arith.constant 3.200000e+01 : f32
    %330 = vector.broadcast %cst_233 : f32 to vector<16x1xf32>
    %331 = arith.divf %329, %330 : vector<16x1xf32>
    %332 = vector.broadcast %324 : vector<16x1xf32> to vector<16x32xf32>
    %333 = arith.subf %316, %332 : vector<16x32xf32>
    %cst_234 = arith.constant 9.99999974E-6 : f32
    %334 = vector.broadcast %cst_234 : f32 to vector<16x1xf32>
    %335 = arith.addf %331, %334 : vector<16x1xf32>
    %336 = math.rsqrt %335 : vector<16x1xf32>
    %337 = vector.broadcast %336 : vector<16x1xf32> to vector<16x32xf32>
    %338 = arith.mulf %333, %337 : vector<16x32xf32>
    %339 = vector.broadcast %318 : vector<1x32xf32> to vector<16x32xf32>
    %340 = arith.mulf %338, %339 : vector<16x32xf32>
    %341 = vector.broadcast %320 : vector<1x32xf32> to vector<16x32xf32>
    %342 = arith.addf %340, %341 : vector<16x32xf32>
    %c0_235 = arith.constant 0 : index
    %c0_236 = arith.constant 0 : index
    %343 = vector.load %arg18[%c0_235, %c0_236] : memref<32x128xf32, #tpu.memory_space<vmem>>, vector<32x128xf32>
    %cst_237 = arith.constant dense<0.000000e+00> : vector<16x128xf32>
    %344 = tpu.matmul %342, %343, %cst_237 {dimension_numbers = #tpu.dot_dimension_numbers<[1], [0], [0], [1], [0, 0, 1, 1], [], []>} : vector<16x32xf32>, vector<32x128xf32>, vector<16x128xf32> -> vector<16x128xf32>
    %c0_238 = arith.constant 0 : index
    %c0_239 = arith.constant 0 : index
    %345 = vector.load %arg19[%c0_238, %c0_239] : memref<1x128xf32, #tpu.memory_space<vmem>>, vector<1x128xf32>
    %346 = vector.broadcast %345 : vector<1x128xf32> to vector<16x128xf32>
    %347 = arith.addf %344, %346 : vector<16x128xf32>
    %c0_240 = arith.constant 0 : index
    %c0_241 = arith.constant 0 : index
    %348 = vector.load %arg20[%c0_240, %c0_241] : memref<16x128xf32, #tpu.memory_space<vmem>>, vector<16x128xf32>
    tpu.vector_store %arg20[%c0_240, %c0_241], %347 {strides = array<i32>} : memref<16x128xf32, #tpu.memory_space<vmem>>, vector<16x128xf32>,
    return
  }
}

</mosaic_0001>

<bundles_post_ra>
// kernel: transformer_lm_forward.1
= control target key start
LH: loop header
LB: loop body
LE: loop exit
PB: predicated region body
PF: predicated region fallthrough
CT: control target
= control target key end

     0   :  { %vm80_vm0 = vcmask 261120   ;;  %v4421_v14 = vmov 0.0   ;;  %vm4422_vm1 = vmmov 0   ;;  %vm334_vm2 = vcmask 130048   ;;  %s5145_s2 = inlined_call_operand.vmem [shape: f32[2,2,32,16], index: 2, kind: input, shape index: {}]   ;;  %s5146_s0 = inlined_call_operand.vmem [shape: f32[2,8,32], index: 0, kind: input, shape index: {}]   ;;  %s5147_s3 = inlined_call_operand.vmem [shape: f32[2,2,32,16], index: 3, kind: input, shape index: {}]   ;;  %s5148_s6 = inlined_call_operand.vmem [shape: f32[2,2,1,16], index: 6, kind: input, shape index: {}]   ;;  %s5149_s5 = inlined_call_operand.vmem [shape: f32[2,2,1,16], index: 5, kind: input, shape index: {}]   ;;  %s5150_s4 = inlined_call_operand.vmem [shape: f32[2,2,32,16], index: 4, kind: input, shape index: {}]   ;;  %s5151_s1 = inlined_call_operand.vmem [shape: f32[2,8,8], index: 1, kind: input, shape index: {}]   ;;  %s5152_s7 = inlined_call_operand.vmem [shape: f32[2,2,1,16], index: 7, kind: input, shape index: {}]   ;;  %s5153_s8 = inlined_call_operand.vmem [shape: f32[2,2,16,32], index: 8, kind: input, shape index: {}]   ;;  %s5154_s9 = inlined_call_operand.vmem [shape: f32[2,1,32], index: 9, kind: input, shape index: {}]   ;;  %s5155_s12 = inlined_call_operand.vmem [shape: f32[2,32,128], index: 12, kind: input, shape index: {}]   ;;  %s5156_s10 = inlined_call_operand.vmem [shape: f32[2,1,32], index: 10, kind: input, shape index: {}]   ;;  %s5157_s11 = inlined_call_operand.vmem [shape: f32[2,1,32], index: 11, kind: input, shape index: {}]   ;;  %s5158_s14 = inlined_call_operand.vmem [shape: f32[2,128,32], index: 14, kind: input, shape index: {}]   ;;  %s5159_s13 = inlined_call_operand.vmem [shape: f32[2,1,128], index: 13, kind: input, shape index: {}]   ;;  %s5160_s15 = inlined_call_operand.vmem [shape: f32[2,1,32], index: 15, kind: input, shape index: {}]   ;;  %s5161_s16 = inlined_call_operand.vmem [shape: f32[2,1,32], index: 16, kind: input, shape index: {}]   ;;  %s5162_s17 = inlined_call_operand.vmem [shape: f32[2,1,32], index: 17, kind: input, shape index: {}]   ;;  %s5163_s18 = inlined_call_operand.vmem [shape: f32[32,128], index: 18, kind: input, shape index: {}]   ;;  %s5164_s19 = inlined_call_operand.vmem [shape: f32[1,128], index: 19, kind: input, shape index: {}]   ;;  %s5165_s20 = inlined_call_operand.vmem [shape: f32[16,128], index: 20, kind: output, shape index: {}]  }
   0x1   :  { %5171 = sst [smem:[#allocation2_spill]] %s5145_s2  ;;  %v248_v25 = vld [vmem:[%s5150_s4] sm:$0xff]  ;;  %v249_v26 = vld [vmem:[%s5150_s4 + $0x8] sm:$0xff]  ;;  %v250_v27 = vld [vmem:[%s5150_s4 + $0x10] sm:$0xff]  ;;  %vm487_vm3 = vcmask 64512  }
   0x2   :  { %5172 = sst [smem:[#allocation3_spill]] %s5146_s0  ;;  %s5176_s23 = sld [smem:[#allocation2_spill]]  ;;  %v4175_v28 = vpack.c.bf16 %v249_v26, %v248_v25  ;;  %v251_v29 = vld [vmem:[%s5150_s4 + $0x18] sm:$0xff]  ;;  %v4610_v31 = vld [vmem:[%s5151_s1] sm:$0xff]  ;;  %v4616_v35 = vld [vmem:[%s5151_s1 + $0x8] sm:$0xff] }
   0x3   :  { %5173 = sst [smem:[#allocation4_spill]] %s5147_s3  ;;  %s5177_s29 = sld [smem:[#allocation3_spill]]  ;;  %v4179_v30 = vpack.c.bf16 %v251_v29, %v250_v27  ;;  %v3481_v52 = vld [vmem:[%s5152_s7] ss:$0 sm:$0xff]  ;;  %v3508_v29 = vld [vmem:[%s5150_s4 + $0x30] sm:$0xff] }
   0x4   :  { %5174 = sst [smem:[#allocation5_spill]] %s5148_s6  ;;  %s5178_s21 = sld [smem:[#allocation4_spill]]  ;;  %4176 = vmatprep.subr.bf16.mxu0 %v4175_v28  ;;  %v3506_v27 = vld [vmem:[%s5150_s4 + $0x20] sm:$0xff] }
   0x5   :  { %5175 = sst [smem:[#allocation6_spill]] %s5149_s5  ;;  %4178 = vmatpush3.bf16.msra.mxu0 %v4175_v28  ;;  %v3507_v28 = vld [vmem:[%s5150_s4 + $0x28] sm:$0xff] }
   0x6   :  { %s5180_s0 = sld [smem:[#allocation6_spill]]  ;;  %4180 = vmatprep.subr.bf16.mxu0 %v4179_v30 }
   0x8   :  { %v69_v0 = vld [vmem:[%s5176_s23] sm:$0xff]  ;;  %v70_v1 = vld [vmem:[%s5176_s23 + $0x8] sm:$0xff]  ;;  %v71_v2 = vld [vmem:[%s5176_s23 + $0x10] sm:$0xff] }
   0x9   :  { %v4159_v3 = vpack.c.bf16 %v70_v1, %v69_v0  ;;  %v72_v4 = vld [vmem:[%s5176_s23 + $0x18] sm:$0xff]  ;;  %v4543_v5 = vld [vmem:[%s5177_s29] sm:$0xff]  ;;  %v4564_v12 = vld [vmem:[%s5177_s29 + $0x8] sm:$0xff]  ;;  %s5179_s29 = sld [smem:[#allocation5_spill]]  ;;  %4182 = vmatpush3.bf16.msra.mxu0 %v4179_v30  ;;  %v4199_v30 = vpack.c.bf16 %v3507_v28, %v3506_v27 }
   0xa   :  { %v4163_v6 = vpack.c.bf16 %v72_v4, %v71_v2  ;;  %3824 = vmatprep.mubr.msk.f32.mxu1 %vm80_vm0, %v4543_v5  ;;  %v162_v7 = vld [vmem:[%s5178_s21] sm:$0xff]  ;;  %v163_v8 = vld [vmem:[%s5178_s21 + $0x8] sm:$0xff]  ;;  %3846 = vmatprep.mubr.msk.f32.mxu0 %vm80_vm0, %v4543_v5  ;;  %v164_v10 = vld [vmem:[%s5178_s21 + $0x10] sm:$0xff] }
   0xb   :  { %4160 = vmatprep.subr.bf16.mxu1 %v4159_v3  ;;  %v4167_v9 = vpack.c.bf16 %v163_v8, %v162_v7  ;;  %v165_v11 = vld [vmem:[%s5178_s21 + $0x18] sm:$0xff]  ;;  %v3490_v56 = vld [vmem:[%s5176_s23 + $0x20] sm:$0xff]  ;;  %v3491_v57 = vld [vmem:[%s5176_s23 + $0x28] sm:$0xff] }
   0xc   :  { %4162 = vmatpush3.bf16.msra.mxu1 %v4159_v3  ;;  %v4171_v13 = vpack.c.bf16 %v165_v11, %v164_v10  ;;  %v3475_v20 = vld [vmem:[%s5180_s0] ss:$0 sm:$0xff]  ;;  %3847 = vmatmul.mubr.msk.f32.vlgmr.msra.gmra.mrb[0].mxu0 %vm80_vm0, %v4564_v12  ;;  %v4183_v58 = vpack.c.bf16 %v3491_v57, %v3490_v56  ;;  %v3492_v59 = vld [vmem:[%s5176_s23 + $0x30] sm:$0xff]  ;;  %v3493_v60 = vld [vmem:[%s5176_s23 + $0x38] sm:$0xff] }
   0xd   :  { %4164 = vmatprep.subr.bf16.mxu1 %v4163_v6  ;;  %3877 = vmatprep.mubr.msk.f32.mxu0 %vm80_vm0, %v4543_v5  ;;  %v4187_v61 = vpack.c.bf16 %v3493_v60, %v3492_v59  ;;  %v3498_v0 = vld [vmem:[%s5178_s21 + $0x20] sm:$0xff]  ;;  %v3499_v1 = vld [vmem:[%s5178_s21 + $0x28] sm:$0xff]  ;;  %v3501_v7 = vld [vmem:[%s5178_s21 + $0x38] sm:$0xff] }
   0xe   :  { %4184 = vmatprep.subr.bf16.mxu0 %v4183_v58  ;;  %v4191_v4 = vpack.c.bf16 %v3499_v1, %v3498_v0  ;;  %v3520_v0 = vld [vmem:[%s5153_s8 + $0x10] sm:$0xff]  ;;  %v3521_v1 = vld [vmem:[%s5153_s8 + $0x18] sm:$0xff] }
   0xf   :  { %v3478_v17 = vld [vmem:[%s5179_s29] ss:$0 sm:$0xff]  ;;  %4186 = vmatpush3.bf16.msra.mxu0 %v4183_v58 }
  0x10   :  { %4166 = vmatpush3.bf16.msra.mxu1 %v4163_v6  ;;  %4188 = vmatprep.subr.bf16.mxu0 %v4187_v61  ;;  %v3500_v6 = vld [vmem:[%s5178_s21 + $0x30] sm:$0xff] }
  0x11   :  { %4168 = vmatprep.subr.bf16.mxu1 %v4167_v9  ;;  %v4195_v10 = vpack.c.bf16 %v3501_v7, %v3500_v6 }
  0x13   :  { %3825 = vmatmul.mubr.msk.f32.vlgmr.msra.gmra.mrb[0].mxu1 %vm80_vm0, %v4564_v12  ;;  %4190 = vmatpush3.bf16.msra.mxu0 %v4187_v61 }
  0x14   :  { %4170 = vmatpush3.bf16.msra.mxu1 %v4167_v9  ;;  %3835 = vmatprep.mubr.msk.f32.mxu1 %vm80_vm0, %v4543_v5 }
  0x15   :  { %4172 = vmatprep.subr.bf16.mxu1 %v4171_v13  ;;  %4200 = vmatprep.subr.bf16.mxu0 %v4199_v30 }
  0x16   :  { %3878 = vmatmul.mubr.msk.f32.vlgmr.msra.gmra.mrb[2].mxu0 %vm80_vm0, %v4564_v12 }
  0x17   :  { %3899 = vmatprep.mubr.msk.f32.mxu0 %vm80_vm0, %v4543_v5  ;;  %4202 = vmatpush3.bf16.msra.mxu0 %v4199_v30 }
  0x18   :  { %4174 = vmatpush3.bf16.msra.mxu1 %v4171_v13 }
  0x19   :  { %3849 = vmatprep.subr.mxu1 %v4421_v14 }
  0x1b   :  { %3836 = vmatmul.mubr.msk.f32.vlgmr.msra.gmra.mrb[2].mxu1 %vm80_vm0, %v4564_v12 }
  0x1c   :  { %3851 = vmatprep.mubr.msk.f32.mxu1 %vm4422_vm1, %v4421_v14 }
  0xdf   :  { %v3848_v51 = vpop.f32.mrb[0].mxu0 }
  0xe0   :  { %v325_v53 = vpop.f32.mrb[1].mxu0  ;;  %v331_v54 = vadd.f32 %v3848_v51, %v3481_v52 }
  0xe1   :  { %v326_v55 = vadd.f32 %v3481_v52, %v325_v53 }
  0xe6   :  { %v3826_v15 = vpop.f32.mrb[0].mxu1 }
  0xe7   :  { %v153_v16 = vpop.f32.mrb[1].mxu1  ;;  %v159_v24 = vadd.f32 %v3826_v15, %v3475_v20 }
  0xe8   :  { %v154_v22 = vadd.f32 %v3475_v20, %v153_v16 }
  0xe9   :  { %v3879_v11 = vpop.f32.mrb[2].mxu0 }
  0xea   :  { %v737_v13 = vpop.f32.mrb[3].mxu0 }
  0xee   :  { %v3837_v18 = vpop.f32.mrb[2].mxu1 }
  0xef   :  { %v239_v19 = vpop.f32.mrb[3].mxu1  ;;  %v245_v23 = vadd.f32 %v3837_v18, %v3478_v17 }
  0xf0   :  { %v240_v21 = vadd.f32 %v3478_v17, %v239_v19  ;;  %v3503_v19 = vld [vmem:[%s5179_s29 + $0x1] ss:$0 sm:$0xff] }
  0xf2   :  { %3850 = vmatpush3.xpose.msk.msra.mxu1 %vm334_vm2, %v240_v21  ;;  %v3495_v21 = vld [vmem:[%s5180_s0 + $0x1] ss:$0 sm:$0xff] }
  0xf3   :  { %3854 = vmatprep.subr.mxu1 %v4421_v14  ;;  %v743_v26 = vadd.f32 %v3879_v11, %v3495_v21  ;;  %v3526_v11 = vld [vmem:[%s5154_s9] ss:$0 sm:$0xff] }
  0xf5   :  { %3852 = vmatmul.mubr.msk.f32.vlgmr.msra.gmra.mrb[4].mxu1 %vm334_vm2, %v154_v22 }
  0xf6   :  { %3855 = vmatpush3.xpose.msk.msra.mxu1 %vm334_vm2, %v245_v23  ;;  %3856 = vmatprep.mubr.msk.f32.mxu1 %vm4422_vm1, %v4421_v14 }
  0xf7   :  { %3859 = vmatprep.subr.mxu1 %v4421_v14 }
  0xf9   :  { %3857 = vmatmul.mubr.msk.f32.vlgmr.msra.gmra.mrb[6].mxu1 %vm334_vm2, %v159_v24  ;;  %v738_v24 = vadd.f32 %v3495_v21, %v737_v13 }
  0xfa   :  { %3861 = vmatprep.mubr.msk.f32.mxu1 %vm4422_vm1, %v4421_v14  ;;  %3860 = vmatpush3.msra.mxu1 %v326_v55 }
  0xfb   :  { %3864 = vmatprep.subr.mxu1 %v4421_v14 }
 0x1c8   :  { %v407_v32 = vpop.f32.mrb[4].mxu1 }
 0x1c9   :  { %v408_v33 = vadd.f32 %v407_v32, %v4610_v31  ;;  %v3853_v34 = vpop.f32.mrb[5].mxu1  ;;  %v3509_v32 = vld [vmem:[%s5150_s4 + $0x38] sm:$0xff] }
 0x1cb   :  { %v488_v36 = vsel %vm487_vm3, %v408_v33, -inf }
 0x1cc   :  { %489 = vmax.xlane.f32.xlu0 %v488_v36  ;;  %v483_v37 = vpop.f32.mrb[6].mxu1 }
 0x1cd   :  { %v484_v38 = vadd.f32 %v483_v37, %v4616_v35  ;;  %v3858_v39 = vpop.f32.mrb[7].mxu1 }
 0x1cf   :  { %v491_v40 = vsel %vm487_vm3, %v484_v38, -inf }
 0x1d0   :  { %492 = vmax.xlane.f32.xlu0 %v491_v40 }
 0x259   :  { %v490_v41 = vpop.xlane.xlu0 %489 }
 0x25a   :  { %v494_v42 = vsub.f32 %v408_v33, %v490_v41  ;;  %v4203_v33 = vpack.c.bf16 %v3509_v32, %v3508_v29  ;;  %v1464_v32 = vld [vmem:[%s5155_s12 + $0x8] sm:$0xff] }
 0x25c   :  { %v496_v43 = vmul.f32 1.442695, %v494_v42  ;;  %4204 = vmatprep.subr.bf16.mxu0 %v4203_v33 }
 0x25d   :  { %v493_v44 = vpop.xlane.xlu0 %492  ;;  %4206 = vmatpush3.bf16.msra.mxu0 %v4203_v33 }
 0x25e   :  { %4365 = vpow2.f32 %v496_v43  ;;  %v495_v45 = vsub.f32 %v484_v38, %v493_v44  ;;  %3912 = vmatprep.subr.mxu0 %v4421_v14 }
 0x260   :  { %v498_v46 = vmul.f32 1.442695, %v495_v45  ;;  %3900 = vmatmul.mubr.msk.f32.vlgmr.msra.gmra.mrb[4].mxu0 %vm80_vm0, %v4564_v12 }
 0x261   :  { %3914 = vmatprep.mubr.msk.f32.mxu0 %vm4422_vm1, %v4421_v14 }
 0x262   :  { %4367 = vpow2.f32 %v498_v46 }
 0x268   :  { %v4366_v47 = vpop.eup %4365 }
 0x269   :  { %v500_v48 = vsel %vm487_vm3, %v4366_v47, 0.0 }
 0x26a   :  { %501 = vadd.xlane.f32.xlu1 %v500_v48 }
 0x26c   :  { %v4368_v49 = vpop.eup %4367 }
 0x26d   :  { %v503_v50 = vsel %vm487_vm3, %v4368_v49, 0.0 }
 0x26e   :  { %504 = vadd.xlane.f32.xlu1 %v503_v50 }
 0x2f7   :  { %v502_v62 = vpop.xlane.xlu1 %501 }
 0x2f8   :  { %4369 = vrcp.f32 %v502_v62 }
 0x2fb   :  { %v505_v63 = vpop.xlane.xlu1 %504 }
 0x2fc   :  { %4371 = vrcp.f32 %v505_v63 }
 0x302   :  { %v4370_v2 = vpop.eup %4369 }
 0x303   :  { %v508_v3 = vmul.f32 %v4370_v2, %v4366_v47  ;;  %v4207_v2 = vpack.c.bf16 %v3521_v1, %v3520_v0  ;;  %v1580_v0 = vld [vmem:[%s5158_s14 + $0x38] sm:$0xff] }
 0x305   :  { %3862 = vmatmul.mubr.msk.f32.vlgmr.msra.gmra.mrb[8].mxu1 %vm487_vm3, %v508_v3  ;;  %v656_v3 = vld [vmem:[%s5153_s8] sm:$0xff] }
 0x306   :  { %v4372_v8 = vpop.eup %4371  ;;  %3865 = vmatpush3.msra.mxu1 %v331_v54  ;;  %3866 = vmatprep.mubr.msk.f32.mxu1 %vm4422_vm1, %v4421_v14  ;;  %v3511_v54 = vld [vmem:[%s5152_s7 + $0x1] ss:$0 sm:$0xff] }
 0x307   :  { %v509_v9 = vmul.f32 %v4372_v8, %v4368_v49  ;;  %4192 = vmatprep.subr.bf16.mxu1 %v4191_v4 }
 0x309   :  { %3867 = vmatmul.mubr.msk.f32.vlgmr.msra.gmra.mrb[10].mxu1 %vm487_vm3, %v509_v9 }
 0x30a   :  { %4194 = vmatpush3.bf16.msra.mxu1 %v4191_v4  ;;  %3888 = vmatprep.mubr.msk.f32.mxu1 %vm80_vm0, %v4543_v5  ;;  %v657_v4 = vld [vmem:[%s5153_s8 + $0x8] sm:$0xff] }
 0x30b   :  { %4196 = vmatprep.subr.bf16.mxu1 %v4195_v10  ;;  %v4211_v6 = vpack.c.bf16 %v657_v4, %v656_v3  ;;  %v1582_v3 = vld [vmem:[%s5158_s14 + $0x48] sm:$0xff]  ;;  %v1583_v4 = vld [vmem:[%s5158_s14 + $0x50] sm:$0xff] }
 0x30e   :  { %4198 = vmatpush3.bf16.msra.mxu1 %v4195_v10 }
 0x30f   :  { %3902 = vmatprep.subr.mxu1 %v4421_v14 }
 0x311   :  { %3889 = vmatmul.mubr.msk.f32.vlgmr.msra.gmra.mrb[12].mxu1 %vm80_vm0, %v4564_v12 }
 0x312   :  { %3904 = vmatprep.mubr.msk.f32.mxu1 %vm4422_vm1, %v4421_v14 }
 0x333   :  { %v3901_v53 = vpop.f32.mrb[4].mxu0 }
 0x334   :  { %v913_v55 = vpop.f32.mrb[5].mxu0  ;;  %v919_v57 = vadd.f32 %v3901_v53, %v3511_v54 }
 0x335   :  { %v914_v56 = vadd.f32 %v3511_v54, %v913_v55  ;;  %v1573_v54 = vld [vmem:[%s5158_s14] sm:$0xff]  ;;  %v1574_v55 = vld [vmem:[%s5158_s14 + $0x8] sm:$0xff] }
 0x337   :  { %3913 = vmatpush3.msra.mxu0 %v914_v56  ;;  %v4223_v56 = vpack.c.bf16 %v1574_v55, %v1573_v54 }
 0x338   :  { %4208 = vmatprep.subr.bf16.mxu0 %v4207_v2 }
 0x3d8   :  { %v4666_v15 = vpop.f32.mrb[8].mxu1 }
 0x3d9   :  { %v3863_v16 = vpop.f32.mrb[9].mxu1 }
 0x3dc   :  { %v4668_v17 = vpop.f32.mrb[10].mxu1 }
 0x3dd   :  { %v3868_v18 = vpop.f32.mrb[11].mxu1 }
 0x3e4   :  { %v3890_v20 = vpop.f32.mrb[12].mxu1 }
 0x3e5   :  { %v825_v22 = vpop.f32.mrb[13].mxu1  ;;  %v831_v25 = vadd.f32 %v3890_v20, %v3503_v19 }
 0x3e6   :  { %v826_v23 = vadd.f32 %v3503_v19, %v825_v22 }
 0x3e8   :  { %3903 = vmatpush3.xpose.msk.msra.mxu1 %vm334_vm2, %v826_v23 }
 0x3e9   :  { %3907 = vmatprep.subr.mxu1 %v4421_v14 }
 0x3eb   :  { %3905 = vmatmul.mubr.msk.f32.vlgmr.msra.gmra.mrb[14].mxu1 %vm334_vm2, %v738_v24 }
 0x3ec   :  { %3908 = vmatpush3.xpose.msk.msra.mxu1 %vm334_vm2, %v831_v25  ;;  %3909 = vmatprep.mubr.msk.f32.mxu1 %vm4422_vm1, %v4421_v14 }
 0x3ed   :  { %3917 = vmatprep.subr.mxu1 %v4421_v14 }
 0x3ef   :  { %3910 = vmatmul.mubr.msk.f32.vlgmr.msra.gmra.mrb[16].mxu1 %vm334_vm2, %v743_v26 }
 0x3f0   :  { %3919 = vmatprep.mubr.msk.f32.mxu1 %vm4422_vm1, %v4421_v14  ;;  %3918 = vmatpush3.msra.mxu1 %v919_v57  ;;  %v1575_v57 = vld [vmem:[%s5158_s14 + $0x10] sm:$0xff] }
 0x4be   :  { %v994_v34 = vpop.f32.mrb[14].mxu1 }
 0x4bf   :  { %v995_v36 = vadd.f32 %v994_v34, %v4610_v31  ;;  %v3906_v37 = vpop.f32.mrb[15].mxu1  ;;  %v1465_v34 = vld [vmem:[%s5155_s12 + $0x10] sm:$0xff] }
 0x4c1   :  { %v1074_v38 = vsel %vm487_vm3, %v995_v36, -inf }
 0x4c2   :  { %1075 = vmax.xlane.f32.xlu0 %v1074_v38  ;;  %v1070_v39 = vpop.f32.mrb[16].mxu1 }
 0x4c3   :  { %v1071_v40 = vadd.f32 %v1070_v39, %v4616_v35  ;;  %v3911_v41 = vpop.f32.mrb[17].mxu1 }
 0x4c5   :  { %v1077_v42 = vsel %vm487_vm3, %v1071_v40, -inf }
 0x4c6   :  { %1078 = vmax.xlane.f32.xlu1 %v1077_v42 }
 0x54f   :  { %v1076_v43 = vpop.xlane.xlu0 %1075 }
 0x550   :  { %v1080_v44 = vsub.f32 %v995_v36, %v1076_v43  ;;  %v1466_v36 = vld [vmem:[%s5155_s12 + $0x18] sm:$0xff] }
 0x551   :  { %v4219_v37 = vpack.c.bf16 %v1466_v36, %v1465_v34 }
 0x552   :  { %v1082_v45 = vmul.f32 1.442695, %v1080_v44 }
 0x553   :  { %v1079_v46 = vpop.xlane.xlu1 %1078 }
 0x554   :  { %4373 = vpow2.f32 %v1082_v45  ;;  %v1081_v47 = vsub.f32 %v1071_v40, %v1079_v46  ;;  %v3527_v45 = vld [vmem:[%s5156_s10] ss:$0 sm:$0xff] }
 0x556   :  { %v1084_v48 = vmul.f32 1.442695, %v1081_v47 }
 0x558   :  { %4375 = vpow2.f32 %v1084_v48 }
 0x55e   :  { %v4374_v49 = vpop.eup %4373 }
 0x55f   :  { %v1086_v50 = vsel %vm487_vm3, %v4374_v49, 0.0 }
 0x560   :  { %1087 = vadd.xlane.f32.xlu0 %v1086_v50 }
 0x562   :  { %v4376_v51 = vpop.eup %4375 }
 0x563   :  { %v1089_v52 = vsel %vm487_vm3, %v4376_v51, 0.0 }
 0x564   :  { %1090 = vadd.xlane.f32.xlu1 %v1089_v52 }
 0x5ed   :  { %v1088_v58 = vpop.xlane.xlu0 %1087 }
 0x5ee   :  { %4377 = vrcp.f32 %v1088_v58  ;;  %v1576_v58 = vld [vmem:[%s5158_s14 + $0x18] sm:$0xff] }
 0x5f1   :  { %v1091_v59 = vpop.xlane.xlu1 %1090 }
 0x5f2   :  { %4379 = vrcp.f32 %v1091_v59  ;;  %v4227_v59 = vpack.c.bf16 %v1576_v58, %v1575_v57 }
 0x5f8   :  { %v4378_v60 = vpop.eup %4377 }
 0x5f9   :  { %v1094_v61 = vmul.f32 %v4378_v60, %v4374_v49  ;;  %v3528_v49 = vld [vmem:[%s5157_s11] ss:$0 sm:$0xff] }
 0x5fa   :  { %v1577_v60 = vld [vmem:[%s5158_s14 + $0x20] sm:$0xff] }
 0x5fb   :  { %3915 = vmatmul.mubr.msk.f32.vlgmr.msra.gmra.mrb[6].mxu0 %vm487_vm3, %v1094_v61  ;;  %v1578_v61 = vld [vmem:[%s5158_s14 + $0x28] sm:$0xff] }
 0x5fc   :  { %v4380_v62 = vpop.eup %4379  ;;  %4210 = vmatpush3.bf16.msra.mxu0 %v4207_v2  ;;  %v1581_v2 = vld [vmem:[%s5158_s14 + $0x40] sm:$0xff] }
 0x5fd   :  { %v1095_v63 = vmul.f32 %v4380_v62, %v4376_v51  ;;  %4212 = vmatprep.subr.bf16.mxu0 %v4211_v6  ;;  %v4231_v62 = vpack.c.bf16 %v1578_v61, %v1577_v60  ;;  %v3536_v60 = vld [vmem:[%s5176_s23 + $0x48] sm:$0xff] }
 0x5ff   :  { %3920 = vmatmul.mubr.msk.f32.vlgmr.msra.gmra.mrb[18].mxu1 %vm487_vm3, %v1095_v63  ;;  %v1579_v63 = vld [vmem:[%s5158_s14 + $0x30] sm:$0xff] }
 0x600   :  { %v4235_v1 = vpack.c.bf16 %v1580_v0, %v1579_v63  ;;  %v3538_v63 = vld [vmem:[%s5176_s23 + $0x58] sm:$0xff] }
 0x6ce   :  { %v1165_v7 = vpop.f32.mrb[6].mxu0 }
 0x6cf   :  { %v3916_v8 = vpop.f32.mrb[7].mxu0  ;;  %3926 = vmatprep.mubr.msk.f32.mxu0 %vm334_vm2, %v1165_v7  ;;  %v1584_v7 = vld [vmem:[%s5158_s14 + $0x58] sm:$0xff] }
 0x6d0   :  { %v4243_v8 = vpack.c.bf16 %v1584_v7, %v1583_v4 }
 0x6d2   :  { %v1238_v9 = vpop.f32.mrb[18].mxu1 }
 0x6d3   :  { %v3921_v10 = vpop.f32.mrb[19].mxu1  ;;  %3927 = vmatmul.mubr.msk.f32.vlgmr.msra.gmra.mrb[8].mxu0 %vm334_vm2, %v1238_v9  ;;  %v1585_v9 = vld [vmem:[%s5158_s14 + $0x60] sm:$0xff] }
 0x6d4   :  { %4214 = vmatpush3.bf16.msra.mxu0 %v4211_v6  ;;  %3933 = vmatprep.mubr.msk.f32.mxu0 %vm334_vm2, %v4666_v15  ;;  %v4239_v6 = vpack.c.bf16 %v1582_v3, %v1581_v2  ;;  %v1586_v10 = vld [vmem:[%s5158_s14 + $0x68] sm:$0xff] }
 0x6d5   :  { %4224 = vmatprep.subr.bf16.mxu0 %v4223_v56  ;;  %v3544_v2 = vld [vmem:[%s5178_s21 + $0x48] sm:$0xff] }
 0x6db   :  { %3934 = vmatmul.mubr.msk.f32.vlgmr.msra.gmra.mrb[8].mxu0 %vm334_vm2, %v4668_v17 }
 0x6dc   :  { %4226 = vmatpush3.bf16.msra.mxu0 %v4223_v56 }
 0x6dd   :  { %4228 = vmatprep.subr.bf16.mxu0 %v4227_v59 }
 0x6e0   :  { %4230 = vmatpush3.bf16.msra.mxu0 %v4227_v59 }
 0x6e1   :  { %4232 = vmatprep.subr.bf16.mxu0 %v4231_v62 }
 0x6e4   :  { %4234 = vmatpush3.bf16.msra.mxu0 %v4231_v62  ;;  %v3537_v62 = vld [vmem:[%s5176_s23 + $0x50] sm:$0xff] }
 0x6e5   :  { %4236 = vmatprep.subr.bf16.mxu0 %v4235_v1  ;;  %v4259_v0 = vpack.c.bf16 %v3538_v63, %v3537_v62 }
 0x6e8   :  { %4238 = vmatpush3.bf16.msra.mxu0 %v4235_v1  ;;  %v3543_v1 = vld [vmem:[%s5178_s21 + $0x40] sm:$0xff] }
 0x6e9   :  { %4240 = vmatprep.subr.bf16.mxu0 %v4239_v6  ;;  %v4263_v3 = vpack.c.bf16 %v3544_v2, %v3543_v1  ;;  %v3567_v1 = vld [vmem:[%s5176_s23 + $0x60] sm:$0xff]  ;;  %v3568_v2 = vld [vmem:[%s5176_s23 + $0x68] sm:$0xff] }
 0x6ec   :  { %4242 = vmatpush3.bf16.msra.mxu0 %v4239_v6 }
 0x6ed   :  { %4244 = vmatprep.subr.bf16.mxu0 %v4243_v8 }
 0x6f0   :  { %4246 = vmatpush3.bf16.msra.mxu0 %v4243_v8 }
 0x7ae   :  { %v3935_v13 = vpop.f32.mrb[8].mxu0 }
 0x7af   :  { %v1415_v16 = vadd.f32 %v3935_v13, %v3526_v11  ;;  %v1398_v18 = vpop.f32.mrb[9].mxu0  ;;  %v1587_v13 = vld [vmem:[%s5158_s14 + $0x70] sm:$0xff] }
 0x7b0   :  { %v1414_v19 = vadd.f32 %v3526_v11, %v1398_v18  ;;  %v4247_v11 = vpack.c.bf16 %v1586_v10, %v1585_v9 }
 0x7b1   :  { %v1417_v20 = vadd.f32 %v1415_v16, %v4564_v12  ;;  %v1588_v16 = vld [vmem:[%s5158_s14 + $0x78] sm:$0xff] }
 0x7b2   :  { %v1416_v21 = vadd.f32 %v1414_v19, %v4543_v5  ;;  %v1463_v5 = vld [vmem:[%s5155_s12] sm:$0xff]  ;;  %4248 = vmatprep.subr.bf16.mxu0 %v4247_v11  ;;  %v4251_v18 = vpack.c.bf16 %v1588_v16, %v1587_v13 }
 0x7b3   :  { %v1423_v22 = vsel %vm80_vm0, %v1417_v20, 0.0  ;;  %v4215_v33 = vpack.c.bf16 %v1464_v32, %v1463_v5  ;;  %4250 = vmatpush3.bf16.msra.mxu0 %v4247_v11  ;;  %v3529_v19 = vld [vmem:[%s5159_s13] ss:$0 sm:$0xff] }
 0x7b4   :  { %1424 = vadd.xlane.f32.xlu1 %v1423_v22  ;;  %v1420_v15 = vsel %vm80_vm0, %v1416_v21, 0.0  ;;  %4252 = vmatprep.subr.bf16.mxu0 %v4251_v18  ;;  %v3533_v13 = vld [vmem:[%s5161_s16] ss:$0 sm:$0xff] }
 0x7b5   :  { %1421 = vadd.xlane.f32.xlu0 %v1420_v15  ;;  %4216 = vmatprep.subr.bf16.mxu1 %v4215_v33 }
 0x7b6   :  { %4218 = vmatpush3.bf16.msra.mxu1 %v4215_v33 }
 0x7b7   :  { %4220 = vmatprep.subr.bf16.mxu1 %v4219_v37  ;;  %4254 = vmatpush3.bf16.msra.mxu0 %v4251_v18 }
 0x7b8   :  { %4025 = vmatprep.subr.mxu0 %v4421_v14 }
 0x7ba   :  { %4222 = vmatpush3.bf16.msra.mxu1 %v4219_v37 }
 0x841   :  { %v1425_v23 = vpop.xlane.xlu1 %1424 }
 0x842   :  { %v1428_v17 = vmul.f32 0.03125, %v1425_v23  ;;  %v1422_v24 = vpop.xlane.xlu0 %1421 }
 0x843   :  { %v1427_v25 = vmul.f32 0.03125, %v1422_v24 }
 0x844   :  { %v1430_v26 = vsub.f32 %v1417_v20, %v1428_v17 }
 0x845   :  { %v1429_v27 = vsub.f32 %v1416_v21, %v1427_v25 }
 0x846   :  { %v1432_v28 = vmul.f32 %v1430_v26, %v1430_v26 }
 0x847   :  { %v1431_v29 = vmul.f32 %v1429_v27, %v1429_v27 }
 0x848   :  { %v1436_v30 = vsel %vm80_vm0, %v1432_v28, 0.0 }
 0x849   :  { %1437 = vadd.xlane.f32.xlu1 %v1436_v30  ;;  %v1433_v12 = vsel %vm80_vm0, %v1431_v29, 0.0 }
 0x84a   :  { %1434 = vadd.xlane.f32.xlu0 %v1433_v12 }
 0x8d6   :  { %v1438_v38 = vpop.xlane.xlu1 %1437 }
 0x8d7   :  { %v1440_v39 = vmul.f32 0.03125, %v1438_v38  ;;  %v1435_v40 = vpop.xlane.xlu0 %1434 }
 0x8d8   :  { %v1439_v41 = vmul.f32 0.03125, %v1435_v40  ;;  %v3532_v40 = vld [vmem:[%s5160_s15] ss:$0 sm:$0xff] }
 0x8d9   :  { %v1442_v42 = vadd.f32 1e-05, %v1440_v39 }
 0x8da   :  { %v1441_v43 = vadd.f32 1e-05, %v1439_v41 }
 0x8db   :  { %4381 = vrsqrt.f32 %v1442_v42 }
 0x8dc   :  { %4383 = vrsqrt.f32 %v1441_v43 }
 0x8e5   :  { %v4382_v44 = vpop.eup %4381 }
 0x8e6   :  { %v4384_v46 = vpop.eup %4383  ;;  %v1446_v47 = vmul.f32 %v4382_v44, %v1430_v26 }
 0x8e7   :  { %v1445_v48 = vmul.f32 %v4384_v46, %v1429_v27 }
 0x8e8   :  { %v1454_v50 = vmul.f32 %v3527_v45, %v1446_v47 }
 0x8e9   :  { %v1453_v51 = vmul.f32 %v3527_v45, %v1445_v48 }
 0x8ea   :  { %v4761_v53 = vadd.f32 %v3528_v49, %v1454_v50 }
 0x8eb   :  { %v4759_v52 = vadd.f32 %v3528_v49, %v1453_v51 }
 0x8ed   :  { %3944 = vmatprep.mubr.msk.f32.mxu1 %vm80_vm0, %v4759_v52 }
 0x8ee   :  { %3945 = vmatmul.mubr.msk.f32.vlgmr.msra.gmra.mrb[20].mxu1 %vm80_vm0, %v4761_v53 }
 0x9c1   :  { %v3946_v20 = vpop.f32.mrb[20].mxu1 }
 0x9c2   :  { %v1552_v21 = vadd.f32 %v3946_v20, %v3529_v19  ;;  %v1546_v22 = vpop.f32.mrb[21].mxu1  ;;  %v3534_v20 = vld [vmem:[%s5162_s17] ss:$0 sm:$0xff] }
 0x9c3   :  { %v1547_v15 = vadd.f32 %v3529_v19, %v1546_v22 }
 0x9c4   :  { %v1556_v23 = vmul.f32 %v1552_v21, %v1552_v21 }
 0x9c5   :  { %v1555_v17 = vmul.f32 %v1547_v15, %v1547_v15 }
 0x9c6   :  { %v1558_v24 = vmul.f32 %v1556_v23, %v1552_v21  ;;  %v3546_v23 = vld [vmem:[%s5178_s21 + $0x58] sm:$0xff] }
 0x9c7   :  { %v1557_v25 = vmul.f32 %v1555_v17, %v1547_v15 }
 0x9c8   :  { %v1560_v26 = vmul.f32 0.044715, %v1558_v24 }
 0x9c9   :  { %v1559_v27 = vmul.f32 0.044715, %v1557_v25 }
 0x9ca   :  { %v1562_v28 = vadd.f32 %v1560_v26, %v1552_v21  ;;  %v3551_v26 = vld [vmem:[%s5150_s4 + $0x40] sm:$0xff] }
 0x9cb   :  { %v1561_v29 = vadd.f32 %v1559_v27, %v1547_v15  ;;  %v3552_v27 = vld [vmem:[%s5150_s4 + $0x48] sm:$0xff] }
 0x9cc   :  { %v1564_v30 = vmul.f32 0.7978846, %v1562_v28  ;;  %v4271_v28 = vpack.c.bf16 %v3552_v27, %v3551_v26  ;;  %v3585_v27 = vld [vmem:[%s5150_s4 + $0x70] sm:$0xff] }
 0x9cd   :  { %v1563_v12 = vmul.f32 0.7978846, %v1561_v29  ;;  %v3553_v29 = vld [vmem:[%s5150_s4 + $0x50] sm:$0xff] }
 0x9ce   :  { %4385 = vtanh.f32 %v1564_v30  ;;  %v3554_v30 = vld [vmem:[%s5150_s4 + $0x58] sm:$0xff] }
 0x9cf   :  { %4387 = vtanh.f32 %v1563_v12  ;;  %v4275_v12 = vpack.c.bf16 %v3554_v30, %v3553_v29 }
 0x9d8   :  { %v4386_v5 = vpop.eup %4385 }
 0x9d9   :  { %v4388_v32 = vpop.eup %4387  ;;  %v1568_v33 = vadd.f32 1.0, %v4386_v5 }
 0x9da   :  { %v1567_v34 = vadd.f32 1.0, %v4388_v32 }
 0x9db   :  { %v1570_v36 = vmul.f32 0.5, %v1568_v33  ;;  %v3548_v33 = vld [vmem:[%s5179_s29 + $0x2] ss:$0 sm:$0xff] }
 0x9dc   :  { %v1569_v37 = vmul.f32 0.5, %v1567_v34 }
 0x9dd   :  { %v1572_v39 = vmul.f32 %v1570_v36, %v1552_v21 }
 0x9de   :  { %v1571_v38 = vmul.f32 %v1569_v37, %v1547_v15  ;;  %v3545_v15 = vld [vmem:[%s5178_s21 + $0x50] sm:$0xff]  ;;  %v3540_v37 = vld [vmem:[%s5180_s0 + $0x2] ss:$0 sm:$0xff] }
 0x9df   :  { %v4267_v25 = vpack.c.bf16 %v3546_v23, %v3545_v15 }
 0x9e0   :  { %3979 = vmatprep.mubr.f32.mxu0 %v1571_v38 }
 0x9e1   :  { %3980 = vmatmul.mubr.f32.vlgmr.msra.gmra.mrb[10].mxu0 %v1572_v39 }
 0x9e2   :  { %4027 = vmatprep.mubr.msk.f32.mxu0 %vm4422_vm1, %v4421_v14 }
 0xab4   :  { %v3981_v41 = vpop.f32.mrb[10].mxu0 }
 0xab5   :  { %v1668_v42 = vadd.f32 %v3981_v41, %v3532_v40  ;;  %v1662_v43 = vpop.f32.mrb[11].mxu0  ;;  %v3556_v41 = vld [vmem:[%s5152_s7 + $0x2] ss:$0 sm:$0xff] }
 0xab6   :  { %v1663_v44 = vadd.f32 %v3532_v40, %v1662_v43 }
 0xab7   :  { %v1672_v45 = vadd.f32 %v1668_v42, %v4761_v53 }
 0xab8   :  { %v1671_v46 = vadd.f32 %v1663_v44, %v4759_v52  ;;  %v3535_v52 = vld [vmem:[%s5176_s23 + $0x40] sm:$0xff] }
 0xab9   :  { %v1678_v47 = vsel %vm80_vm0, %v1672_v45, 0.0  ;;  %v4255_v61 = vpack.c.bf16 %v3536_v60, %v3535_v52 }
 0xaba   :  { %1679 = vadd.xlane.f32.xlu1 %v1678_v47  ;;  %v1675_v48 = vsel %vm80_vm0, %v1671_v46, 0.0 }
 0xabb   :  { %1676 = vadd.xlane.f32.xlu0 %v1675_v48  ;;  %4256 = vmatprep.subr.bf16.mxu1 %v4255_v61 }
 0xabc   :  { %4258 = vmatpush3.bf16.msra.mxu1 %v4255_v61 }
 0xabd   :  { %4260 = vmatprep.subr.bf16.mxu1 %v4259_v0 }
 0xac0   :  { %4262 = vmatpush3.bf16.msra.mxu1 %v4259_v0 }
 0xac1   :  { %4264 = vmatprep.subr.bf16.mxu1 %v4263_v3 }
 0xb47   :  { %v1680_v49 = vpop.xlane.xlu1 %1679 }
 0xb48   :  { %v1682_v50 = vmul.f32 0.03125, %v1680_v49  ;;  %v1677_v51 = vpop.xlane.xlu0 %1676 }
 0xb49   :  { %v1681_v54 = vmul.f32 0.03125, %v1677_v51 }
 0xb4a   :  { %v1684_v55 = vsub.f32 %v1672_v45, %v1682_v50 }
 0xb4b   :  { %v1683_v56 = vsub.f32 %v1671_v46, %v1681_v54 }
 0xb4c   :  { %v1686_v57 = vmul.f32 %v1684_v55, %v1684_v55 }
 0xb4d   :  { %v1685_v58 = vmul.f32 %v1683_v56, %v1683_v56 }
 0xb4e   :  { %v1690_v59 = vsel %vm80_vm0, %v1686_v57, 0.0 }
 0xb4f   :  { %1691 = vadd.xlane.f32.xlu1 %v1690_v59  ;;  %v1687_v53 = vsel %vm80_vm0, %v1685_v58, 0.0 }
 0xb50   :  { %1688 = vadd.xlane.f32.xlu0 %v1687_v53 }
 0xbdc   :  { %v1692_v4 = vpop.xlane.xlu1 %1691 }
 0xbdd   :  { %v1694_v6 = vmul.f32 0.03125, %v1692_v4  ;;  %v1689_v7 = vpop.xlane.xlu0 %1688  ;;  %v3575_v4 = vld [vmem:[%s5178_s21 + $0x60] sm:$0xff] }
 0xbde   :  { %v1693_v8 = vmul.f32 0.03125, %v1689_v7 }
 0xbdf   :  { %v1696_v9 = vadd.f32 1e-05, %v1694_v6  ;;  %v3576_v6 = vld [vmem:[%s5178_s21 + $0x68] sm:$0xff] }
 0xbe0   :  { %v1695_v10 = vadd.f32 1e-05, %v1693_v8  ;;  %v4287_v7 = vpack.c.bf16 %v3576_v6, %v3575_v4 }
 0xbe1   :  { %4389 = vrsqrt.f32 %v1696_v9 }
 0xbe2   :  { %4391 = vrsqrt.f32 %v1695_v10  ;;  %v3569_v10 = vld [vmem:[%s5176_s23 + $0x70] sm:$0xff] }
 0xbeb   :  { %v4390_v11 = vpop.eup %4389 }
 0xbec   :  { %v4392_v16 = vpop.eup %4391  ;;  %v1700_v18 = vmul.f32 %v4390_v11, %v1684_v55  ;;  %v3570_v11 = vld [vmem:[%s5176_s23 + $0x78] sm:$0xff] }
 0xbed   :  { %v1699_v19 = vmul.f32 %v4392_v16, %v1683_v56 }
 0xbee   :  { %v1708_v21 = vmul.f32 %v3533_v13, %v1700_v18  ;;  %v4283_v18 = vpack.c.bf16 %v3570_v11, %v3569_v10  ;;  %v3565_v10 = vld [vmem:[%s5153_s8 + $0x20] sm:$0xff]  ;;  %v3566_v11 = vld [vmem:[%s5153_s8 + $0x28] sm:$0xff] }
 0xbef   :  { %v1707_v22 = vmul.f32 %v3533_v13, %v1699_v19  ;;  %v3577_v19 = vld [vmem:[%s5178_s21 + $0x70] sm:$0xff] }
 0xbf0   :  { %v4862_v24 = vadd.f32 %v3534_v20, %v1708_v21  ;;  %v3583_v21 = vld [vmem:[%s5150_s4 + $0x60] sm:$0xff] }
 0xbf1   :  { %v4860_v17 = vadd.f32 %v3534_v20, %v1707_v22  ;;  %v3578_v20 = vld [vmem:[%s5178_s21 + $0x78] sm:$0xff]  ;;  %v3584_v22 = vld [vmem:[%s5150_s4 + $0x68] sm:$0xff] }
 0xbf2   :  { %v4295_v26 = vpack.c.bf16 %v3584_v22, %v3583_v21  ;;  %v3604_v21 = vld [vmem:[%s5154_s9 + $0x1] ss:$0 sm:$0xff] }
 0xbf3   :  { %3990 = vmatprep.mubr.msk.f32.mxu1 %vm80_vm0, %v4860_v17 }
 0xbf4   :  { %3991 = vmatmul.mubr.msk.f32.vlgmr.msra.gmra.mrb[22].mxu1 %vm80_vm0, %v4862_v24 }
 0xbf5   :  { %4266 = vmatpush3.bf16.msra.mxu1 %v4263_v3  ;;  %4001 = vmatprep.mubr.msk.f32.mxu1 %vm80_vm0, %v4860_v17  ;;  %v4279_v3 = vpack.c.bf16 %v3568_v2, %v3567_v1 }
 0xbf6   :  { %4268 = vmatprep.subr.bf16.mxu1 %v4267_v25 }
 0xbf9   :  { %4270 = vmatpush3.bf16.msra.mxu1 %v4267_v25  ;;  %v4291_v25 = vpack.c.bf16 %v3578_v20, %v3577_v19 }
 0xbfa   :  { %4272 = vmatprep.subr.bf16.mxu1 %v4271_v28 }
 0xbfc   :  { %4002 = vmatmul.mubr.msk.f32.vlgmr.msra.gmra.mrb[24].mxu1 %vm80_vm0, %v4862_v24 }
 0xbfd   :  { %4274 = vmatpush3.bf16.msra.mxu1 %v4271_v28  ;;  %4012 = vmatprep.mubr.msk.f32.mxu1 %vm80_vm0, %v4860_v17  ;;  %v3586_v28 = vld [vmem:[%s5150_s4 + $0x78] sm:$0xff] }
 0xbfe   :  { %4276 = vmatprep.subr.bf16.mxu1 %v4275_v12  ;;  %v4299_v29 = vpack.c.bf16 %v3586_v28, %v3585_v27 }
 0xc01   :  { %4278 = vmatpush3.bf16.msra.mxu1 %v4275_v12 }
 0xc02   :  { %4015 = vmatprep.subr.mxu1 %v4421_v14 }
 0xc04   :  { %4013 = vmatmul.mubr.msk.f32.vlgmr.msra.gmra.mrb[26].mxu1 %vm80_vm0, %v4862_v24 }
 0xc05   :  { %4017 = vmatprep.mubr.msk.f32.mxu1 %vm4422_vm1, %v4421_v14 }
 0xcc7   :  { %v3992_v5 = vpop.f32.mrb[22].mxu1 }
 0xcc8   :  { %v1802_v32 = vpop.f32.mrb[23].mxu1  ;;  %v1808_v43 = vadd.f32 %v3992_v5, %v3540_v37 }
 0xcc9   :  { %v1803_v39 = vadd.f32 %v3540_v37, %v1802_v32 }
 0xccf   :  { %v4003_v34 = vpop.f32.mrb[24].mxu1 }
 0xcd0   :  { %v1890_v36 = vpop.f32.mrb[25].mxu1  ;;  %v1896_v40 = vadd.f32 %v4003_v34, %v3548_v33 }
 0xcd1   :  { %v1891_v38 = vadd.f32 %v3548_v33, %v1890_v36  ;;  %v3580_v36 = vld [vmem:[%s5179_s29 + $0x3] ss:$0 sm:$0xff] }
 0xcd3   :  { %4016 = vmatpush3.xpose.msk.msra.mxu1 %vm334_vm2, %v1891_v38 }
 0xcd4   :  { %4020 = vmatprep.subr.mxu1 %v4421_v14 }
 0xcd6   :  { %4018 = vmatmul.mubr.msk.f32.vlgmr.msra.gmra.mrb[28].mxu1 %vm334_vm2, %v1803_v39  ;;  %v3572_v39 = vld [vmem:[%s5180_s0 + $0x3] ss:$0 sm:$0xff] }
 0xcd7   :  { %v4014_v42 = vpop.f32.mrb[26].mxu1  ;;  %4021 = vmatpush3.xpose.msk.msra.mxu1 %vm334_vm2, %v1896_v40  ;;  %4022 = vmatprep.mubr.msk.f32.mxu1 %vm4422_vm1, %v4421_v14 }
 0xcd8   :  { %v1984_v44 = vadd.f32 %v4014_v42, %v3556_v41  ;;  %v1978_v45 = vpop.f32.mrb[27].mxu1  ;;  %4030 = vmatprep.subr.mxu1 %v4421_v14 }
 0xcd9   :  { %v1979_v46 = vadd.f32 %v3556_v41, %v1978_v45  ;;  %v3588_v41 = vld [vmem:[%s5152_s7 + $0x3] ss:$0 sm:$0xff] }
 0xcda   :  { %4023 = vmatmul.mubr.msk.f32.vlgmr.msra.gmra.mrb[30].mxu1 %vm334_vm2, %v1808_v43 }
 0xcdb   :  { %4026 = vmatpush3.msra.mxu0 %v1979_v46  ;;  %4031 = vmatpush3.msra.mxu1 %v1984_v44 }
 0xcdc   :  { %4032 = vmatprep.mubr.msk.f32.mxu1 %vm4422_vm1, %v4421_v14  ;;  %4280 = vmatprep.subr.bf16.mxu0 %v4279_v3 }
 0xcdd   :  { %4288 = vmatprep.subr.bf16.mxu1 %v4287_v7 }
 0xda9   :  { %v2059_v47 = vpop.f32.mrb[28].mxu1 }
 0xdaa   :  { %v2060_v48 = vadd.f32 %v2059_v47, %v4610_v31  ;;  %v4019_v49 = vpop.f32.mrb[29].mxu1 }
 0xdac   :  { %v2139_v50 = vsel %vm487_vm3, %v2060_v48, -inf }
 0xdad   :  { %2140 = vmax.xlane.f32.xlu1 %v2139_v50  ;;  %v2135_v51 = vpop.f32.mrb[30].mxu1 }
 0xdae   :  { %v2136_v54 = vadd.f32 %v2135_v51, %v4616_v35  ;;  %v4024_v55 = vpop.f32.mrb[31].mxu1 }
 0xdb0   :  { %v2142_v56 = vsel %vm487_vm3, %v2136_v54, -inf }
 0xdb1   :  { %2143 = vmax.xlane.f32.xlu0 %v2142_v56 }
 0xe3a   :  { %v2141_v57 = vpop.xlane.xlu1 %2140 }
 0xe3b   :  { %v2145_v58 = vsub.f32 %v2060_v48, %v2141_v57 }
 0xe3d   :  { %v2147_v59 = vmul.f32 1.442695, %v2145_v58 }
 0xe3e   :  { %v2144_v53 = vpop.xlane.xlu0 %2143 }
 0xe3f   :  { %4393 = vpow2.f32 %v2147_v59  ;;  %v2146_v52 = vsub.f32 %v2136_v54, %v2144_v53 }
 0xe41   :  { %v2149_v60 = vmul.f32 1.442695, %v2146_v52 }
 0xe43   :  { %4395 = vpow2.f32 %v2149_v60 }
 0xe49   :  { %v4394_v61 = vpop.eup %4393 }
 0xe4a   :  { %v2151_v62 = vsel %vm487_vm3, %v4394_v61, 0.0 }
 0xe4b   :  { %2152 = vadd.xlane.f32.xlu1 %v2151_v62 }
 0xe4d   :  { %v4396_v63 = vpop.eup %4395 }
 0xe4e   :  { %v2154_v0 = vsel %vm487_vm3, %v4396_v63, 0.0 }
 0xe4f   :  { %2155 = vadd.xlane.f32.xlu0 %v2154_v0 }
 0xed8   :  { %v2153_v8 = vpop.xlane.xlu1 %2152 }
 0xed9   :  { %4397 = vrcp.f32 %v2153_v8  ;;  %v3598_v8 = vld [vmem:[%s5153_s8 + $0x38] sm:$0xff] }
 0xedc   :  { %v2156_v9 = vpop.xlane.xlu0 %2155 }
 0xedd   :  { %4399 = vrcp.f32 %v2156_v9 }
 0xee3   :  { %v4398_v13 = vpop.eup %4397 }
 0xee4   :  { %v2159_v16 = vmul.f32 %v4398_v13, %v4394_v61  ;;  %v4307_v13 = vpack.c.bf16 %v3566_v11, %v3565_v10  ;;  %v3628_v10 = vld [vmem:[%s5158_s14 + $0xd8] sm:$0xff] }
 0xee6   :  { %4028 = vmatmul.mubr.msk.f32.vlgmr.msra.gmra.mrb[12].mxu0 %vm487_vm3, %v2159_v16 }
 0xee7   :  { %v4400_v15 = vpop.eup %4399  ;;  %4282 = vmatpush3.bf16.msra.mxu0 %v4279_v3  ;;  %4043 = vmatprep.mubr.msk.f32.mxu0 %vm80_vm0, %v4860_v17 }
 0xee8   :  { %v2160_v23 = vmul.f32 %v4400_v15, %v4396_v63  ;;  %4284 = vmatprep.subr.bf16.mxu0 %v4283_v18 }
 0xeea   :  { %4033 = vmatmul.mubr.msk.f32.vlgmr.msra.gmra.mrb[32].mxu1 %vm487_vm3, %v2160_v23 }
 0xeeb   :  { %4286 = vmatpush3.bf16.msra.mxu0 %v4283_v18  ;;  %4290 = vmatpush3.bf16.msra.mxu1 %v4287_v7  ;;  %v3597_v7 = vld [vmem:[%s5153_s8 + $0x30] sm:$0xff] }
 0xeec   :  { %4054 = vmatprep.mubr.msk.f32.mxu1 %vm80_vm0, %v4860_v17  ;;  %4292 = vmatprep.subr.bf16.mxu1 %v4291_v25  ;;  %v4303_v9 = vpack.c.bf16 %v3598_v8, %v3597_v7  ;;  %v3626_v7 = vld [vmem:[%s5158_s14 + $0xc8] sm:$0xff]  ;;  %v3627_v8 = vld [vmem:[%s5158_s14 + $0xd0] sm:$0xff] }
 0xeed   :  { %4296 = vmatprep.subr.bf16.mxu0 %v4295_v26  ;;  %v4339_v11 = vpack.c.bf16 %v3628_v10, %v3627_v8 }
 0xeee   :  { %4044 = vmatmul.mubr.msk.f32.vlgmr.msra.gmra.mrb[14].mxu0 %vm80_vm0, %v4862_v24 }
 0xeef   :  { %4294 = vmatpush3.bf16.msra.mxu1 %v4291_v25  ;;  %4298 = vmatpush3.bf16.msra.mxu0 %v4295_v26 }
 0xef0   :  { %4065 = vmatprep.mubr.msk.f32.mxu0 %vm80_vm0, %v4860_v17  ;;  %4300 = vmatprep.subr.bf16.mxu0 %v4299_v29 }
 0xef1   :  { %4068 = vmatprep.subr.mxu1 %v4421_v14 }
 0xef2   :  { %4055 = vmatmul.mubr.msk.f32.vlgmr.msra.gmra.mrb[34].mxu1 %vm80_vm0, %v4862_v24 }
 0xef3   :  { %4302 = vmatpush3.bf16.msra.mxu0 %v4299_v29  ;;  %4070 = vmatprep.mubr.msk.f32.mxu1 %vm4422_vm1, %v4421_v14 }
 0xef4   :  { %4078 = vmatprep.subr.mxu0 %v4421_v14 }
 0xef6   :  { %4066 = vmatmul.mubr.msk.f32.vlgmr.msra.gmra.mrb[16].mxu0 %vm80_vm0, %v4862_v24 }
 0xef7   :  { %4080 = vmatprep.mubr.msk.f32.mxu0 %vm4422_vm1, %v4421_v14 }
 0xfb9   :  { %v4972_v30 = vpop.f32.mrb[12].mxu0 }
 0xfba   :  { %v4029_v12 = vpop.f32.mrb[13].mxu0 }
 0xfbd   :  { %v4974_v5 = vpop.f32.mrb[32].mxu1 }
 0xfbe   :  { %v4034_v32 = vpop.f32.mrb[33].mxu1 }
 0xfc1   :  { %v4045_v33 = vpop.f32.mrb[14].mxu0 }
 0xfc2   :  { %v2389_v34 = vpop.f32.mrb[15].mxu0  ;;  %v2395_v47 = vadd.f32 %v4045_v33, %v3572_v39 }
 0xfc3   :  { %v2390_v43 = vadd.f32 %v3572_v39, %v2389_v34  ;;  %v3610_v39 = vld [vmem:[%s5155_s12 + $0x28] sm:$0xff] }
 0xfc5   :  { %v4056_v37 = vpop.f32.mrb[34].mxu1 }
 0xfc6   :  { %v2477_v38 = vpop.f32.mrb[35].mxu1  ;;  %v2483_v45 = vadd.f32 %v4056_v37, %v3580_v36 }
 0xfc7   :  { %v2478_v40 = vadd.f32 %v3580_v36, %v2477_v38 }
 0xfc9   :  { %v4067_v42 = vpop.f32.mrb[16].mxu0  ;;  %4069 = vmatpush3.xpose.msk.msra.mxu1 %vm334_vm2, %v2478_v40 }
 0xfca   :  { %v2565_v44 = vpop.f32.mrb[17].mxu0  ;;  %4073 = vmatprep.subr.mxu1 %v4421_v14  ;;  %v2571_v48 = vadd.f32 %v4067_v42, %v3588_v41  ;;  %v3612_v42 = vld [vmem:[%s5155_s12 + $0x38] sm:$0xff] }
 0xfcb   :  { %v2566_v46 = vadd.f32 %v3588_v41, %v2565_v44  ;;  %v3611_v41 = vld [vmem:[%s5155_s12 + $0x30] sm:$0xff] }
 0xfcc   :  { %4071 = vmatmul.mubr.msk.f32.vlgmr.msra.gmra.mrb[36].mxu1 %vm334_vm2, %v2390_v43  ;;  %v4315_v43 = vpack.c.bf16 %v3612_v42, %v3611_v41 }
 0xfcd   :  { %4074 = vmatpush3.xpose.msk.msra.mxu1 %vm334_vm2, %v2483_v45  ;;  %4079 = vmatpush3.msra.mxu0 %v2566_v46 }
 0xfce   :  { %4075 = vmatprep.mubr.msk.f32.mxu1 %vm4422_vm1, %v4421_v14  ;;  %4083 = vmatprep.subr.mxu1 %v4421_v14 }
 0xfcf   :  { %4304 = vmatprep.subr.bf16.mxu0 %v4303_v9 }
 0xfd0   :  { %4076 = vmatmul.mubr.msk.f32.vlgmr.msra.gmra.mrb[38].mxu1 %vm334_vm2, %v2395_v47 }
 0xfd1   :  { %4084 = vmatpush3.msra.mxu1 %v2571_v48  ;;  %4085 = vmatprep.mubr.msk.f32.mxu1 %vm4422_vm1, %v4421_v14 }
0x109f   :  { %v2646_v49 = vpop.f32.mrb[36].mxu1 }
0x10a0   :  { %v2647_v50 = vadd.f32 %v2646_v49, %v4610_v31  ;;  %v4072_v51 = vpop.f32.mrb[37].mxu1 }
0x10a1   :  { %v3607_v51 = vld [vmem:[%s5156_s10 + $0x1] ss:$0 sm:$0xff] }
0x10a2   :  { %v2726_v54 = vsel %vm487_vm3, %v2647_v50, -inf }
0x10a3   :  { %2727 = vmax.xlane.f32.xlu0 %v2726_v54  ;;  %v2722_v55 = vpop.f32.mrb[38].mxu1 }
0x10a4   :  { %v2723_v56 = vadd.f32 %v2722_v55, %v4616_v35  ;;  %v4077_v57 = vpop.f32.mrb[39].mxu1 }
0x10a5   :  { %v3608_v57 = vld [vmem:[%s5157_s11 + $0x1] ss:$0 sm:$0xff] }
0x10a6   :  { %v2729_v58 = vsel %vm487_vm3, %v2723_v56, -inf }
0x10a7   :  { %2730 = vmax.xlane.f32.xlu1 %v2729_v58 }
0x1130   :  { %v2728_v59 = vpop.xlane.xlu0 %2727 }
0x1131   :  { %v2732_v53 = vsub.f32 %v2647_v50, %v2728_v59 }
0x1133   :  { %v2734_v52 = vmul.f32 1.442695, %v2732_v53 }
0x1134   :  { %v2731_v60 = vpop.xlane.xlu1 %2730 }
0x1135   :  { %4401 = vpow2.f32 %v2734_v52  ;;  %v2733_v14 = vsub.f32 %v2723_v56, %v2731_v60  ;;  %v3617_v60 = vld [vmem:[%s5158_s14 + $0x80] sm:$0xff] }
0x1137   :  { %v2736_v61 = vmul.f32 1.442695, %v2733_v14  ;;  %v3618_v14 = vld [vmem:[%s5158_s14 + $0x88] sm:$0xff] }
0x1139   :  { %4403 = vpow2.f32 %v2736_v61  ;;  %v4319_v61 = vpack.c.bf16 %v3618_v14, %v3617_v60 }
0x113f   :  { %v4402_v31 = vpop.eup %4401 }
0x1140   :  { %v2738_v62 = vsel %vm487_vm3, %v4402_v31, 0.0 }
0x1141   :  { %2739 = vadd.xlane.f32.xlu0 %v2738_v62  ;;  %v3620_v62 = vld [vmem:[%s5158_s14 + $0x98] sm:$0xff] }
0x1143   :  { %v4404_v63 = vpop.eup %4403 }
0x1144   :  { %v2741_v0 = vsel %vm487_vm3, %v4404_v63, 0.0 }
0x1145   :  { %2742 = vadd.xlane.f32.xlu1 %v2741_v0  ;;  %v3621_v0 = vld [vmem:[%s5158_s14 + $0xa0] sm:$0xff] }
0x11ce   :  { %v2740_v35 = vpop.xlane.xlu0 %2739 }
0x11cf   :  { %4405 = vrcp.f32 %v2740_v35  ;;  %v3622_v35 = vld [vmem:[%s5158_s14 + $0xa8] sm:$0xff] }
0x11d2   :  { %v2743_v1 = vpop.xlane.xlu1 %2742 }
0x11d3   :  { %4407 = vrcp.f32 %v2743_v1  ;;  %v4327_v1 = vpack.c.bf16 %v3622_v35, %v3621_v0  ;;  %v3380_v0 = vld [vmem:[%s5163_s18 + $0x18] sm:$0xff] }
0x11d9   :  { %v4406_v2 = vpop.eup %4405 }
0x11da   :  { %v2746_v3 = vmul.f32 %v4406_v2, %v4402_v31  ;;  %v3619_v31 = vld [vmem:[%s5158_s14 + $0x90] sm:$0xff] }
0x11db   :  { %v3623_v2 = vld [vmem:[%s5158_s14 + $0xb0] sm:$0xff] }
0x11dc   :  { %4081 = vmatmul.mubr.msk.f32.vlgmr.msra.gmra.mrb[18].mxu0 %vm487_vm3, %v2746_v3  ;;  %v3624_v3 = vld [vmem:[%s5158_s14 + $0xb8] sm:$0xff] }
0x11dd   :  { %v4408_v4 = vpop.eup %4407  ;;  %4306 = vmatpush3.bf16.msra.mxu0 %v4303_v9 }
0x11de   :  { %v2747_v6 = vmul.f32 %v4408_v4, %v4404_v63  ;;  %4308 = vmatprep.subr.bf16.mxu0 %v4307_v13  ;;  %v4323_v63 = vpack.c.bf16 %v3620_v62, %v3619_v31  ;;  %v4331_v4 = vpack.c.bf16 %v3624_v3, %v3623_v2  ;;  %v3378_v31 = vld [vmem:[%s5163_s18 + $0x8] sm:$0xff] }
0x11e0   :  { %4086 = vmatmul.mubr.msk.f32.vlgmr.msra.gmra.mrb[40].mxu1 %vm487_vm3, %v2747_v6  ;;  %v3625_v6 = vld [vmem:[%s5158_s14 + $0xc0] sm:$0xff] }
0x11e1   :  { %v4335_v9 = vpack.c.bf16 %v3626_v7, %v3625_v6 }
0x12af   :  { %v2817_v16 = vpop.f32.mrb[18].mxu0 }
0x12b0   :  { %v4082_v18 = vpop.f32.mrb[19].mxu0  ;;  %4092 = vmatprep.mubr.msk.f32.mxu0 %vm334_vm2, %v2817_v16  ;;  %v3630_v16 = vld [vmem:[%s5158_s14 + $0xe8] sm:$0xff] }
0x12b3   :  { %v2890_v19 = vpop.f32.mrb[40].mxu1 }
0x12b4   :  { %v4087_v20 = vpop.f32.mrb[41].mxu1  ;;  %4093 = vmatmul.mubr.msk.f32.vlgmr.msra.gmra.mrb[20].mxu0 %vm334_vm2, %v2890_v19  ;;  %v3631_v19 = vld [vmem:[%s5158_s14 + $0xf0] sm:$0xff] }
0x12b5   :  { %4310 = vmatpush3.bf16.msra.mxu0 %v4307_v13  ;;  %4099 = vmatprep.mubr.msk.f32.mxu0 %vm334_vm2, %v4972_v30  ;;  %v3629_v13 = vld [vmem:[%s5158_s14 + $0xe0] sm:$0xff]  ;;  %v3632_v20 = vld [vmem:[%s5158_s14 + $0xf8] sm:$0xff] }
0x12b6   :  { %4320 = vmatprep.subr.bf16.mxu0 %v4319_v61  ;;  %v4343_v18 = vpack.c.bf16 %v3630_v16, %v3629_v13  ;;  %v3638_v16 = vld [vmem:[%s5162_s17 + $0x1] ss:$0 sm:$0xff] }
0x12bc   :  { %4100 = vmatmul.mubr.msk.f32.vlgmr.msra.gmra.mrb[20].mxu0 %vm334_vm2, %v4974_v5 }
0x12bd   :  { %4322 = vmatpush3.bf16.msra.mxu0 %v4319_v61 }
0x12be   :  { %4324 = vmatprep.subr.bf16.mxu0 %v4323_v63 }
0x12c1   :  { %4326 = vmatpush3.bf16.msra.mxu0 %v4323_v63  ;;  %v3379_v63 = vld [vmem:[%s5163_s18 + $0x10] sm:$0xff] }
0x12c2   :  { %4328 = vmatprep.subr.bf16.mxu0 %v4327_v1  ;;  %v4355_v35 = vpack.c.bf16 %v3380_v0, %v3379_v63 }
0x12c5   :  { %4330 = vmatpush3.bf16.msra.mxu0 %v4327_v1 }
0x12c6   :  { %4332 = vmatprep.subr.bf16.mxu0 %v4331_v4 }
0x12c9   :  { %4334 = vmatpush3.bf16.msra.mxu0 %v4331_v4 }
0x12ca   :  { %4336 = vmatprep.subr.bf16.mxu0 %v4335_v9 }
0x12cd   :  { %4338 = vmatpush3.bf16.msra.mxu0 %v4335_v9  ;;  %v3637_v9 = vld [vmem:[%s5161_s16 + $0x1] ss:$0 sm:$0xff] }
0x12ce   :  { %4340 = vmatprep.subr.bf16.mxu0 %v4339_v11 }
0x12d1   :  { %4342 = vmatpush3.bf16.msra.mxu0 %v4339_v11 }
0x12d2   :  { %4344 = vmatprep.subr.bf16.mxu0 %v4343_v18 }
0x12d5   :  { %4346 = vmatpush3.bf16.msra.mxu0 %v4343_v18 }
0x138f   :  { %v4101_v22 = vpop.f32.mrb[20].mxu0 }
0x1390   :  { %v3068_v15 = vadd.f32 %v4101_v22, %v3604_v21  ;;  %v3050_v23 = vpop.f32.mrb[21].mxu0  ;;  %v3614_v22 = vld [vmem:[%s5159_s13 + $0x1] ss:$0 sm:$0xff] }
0x1391   :  { %v3067_v25 = vadd.f32 %v3604_v21, %v3050_v23  ;;  %v4347_v21 = vpack.c.bf16 %v3632_v20, %v3631_v19 }
0x1392   :  { %v3070_v26 = vadd.f32 %v3068_v15, %v4862_v24 }
0x1393   :  { %v3069_v27 = vadd.f32 %v3067_v25, %v4860_v17  ;;  %v3609_v17 = vld [vmem:[%s5155_s12 + $0x20] sm:$0xff]  ;;  %4348 = vmatprep.subr.bf16.mxu0 %v4347_v21 }
0x1394   :  { %v3078_v28 = vsel %vm80_vm0, %v3070_v26, 0.0  ;;  %v4311_v40 = vpack.c.bf16 %v3610_v39, %v3609_v17  ;;  %4350 = vmatpush3.bf16.msra.mxu0 %v4347_v21 }
0x1395   :  { %3079 = vadd.xlane.f32.xlu1 %v3078_v28  ;;  %v3075_v29 = vsel %vm80_vm0, %v3069_v27, 0.0 }
0x1396   :  { %3076 = vadd.xlane.f32.xlu0 %v3075_v29  ;;  %4312 = vmatprep.subr.bf16.mxu1 %v4311_v40 }
0x1397   :  { %4314 = vmatpush3.bf16.msra.mxu1 %v4311_v40 }
0x1398   :  { %4316 = vmatprep.subr.bf16.mxu1 %v4315_v43 }
0x139b   :  { %4318 = vmatpush3.bf16.msra.mxu1 %v4315_v43  ;;  %v3634_v43 = vld [vmem:[%s5160_s15 + $0x1] ss:$0 sm:$0xff] }
0x1422   :  { %v3080_v30 = vpop.xlane.xlu1 %3079 }
0x1423   :  { %v3082_v12 = vmul.f32 0.03125, %v3080_v30  ;;  %v3077_v5 = vpop.xlane.xlu0 %3076 }
0x1424   :  { %v3081_v32 = vmul.f32 0.03125, %v3077_v5 }
0x1425   :  { %v3084_v33 = vsub.f32 %v3070_v26, %v3082_v12 }
0x1426   :  { %v3083_v34 = vsub.f32 %v3069_v27, %v3081_v32 }
0x1427   :  { %v3086_v36 = vmul.f32 %v3084_v33, %v3084_v33 }
0x1428   :  { %v3085_v37 = vmul.f32 %v3083_v34, %v3083_v34 }
0x1429   :  { %v3090_v38 = vsel %vm80_vm0, %v3086_v36, 0.0 }
0x142a   :  { %3091 = vadd.xlane.f32.xlu1 %v3090_v38  ;;  %v3087_v24 = vsel %vm80_vm0, %v3085_v37, 0.0 }
0x142b   :  { %3088 = vadd.xlane.f32.xlu0 %v3087_v24 }
0x14b7   :  { %v3092_v44 = vpop.xlane.xlu1 %3091 }
0x14b8   :  { %v3094_v45 = vmul.f32 0.03125, %v3092_v44  ;;  %v3089_v46 = vpop.xlane.xlu0 %3088 }
0x14b9   :  { %v3093_v47 = vmul.f32 0.03125, %v3089_v46 }
0x14ba   :  { %v3096_v48 = vadd.f32 1e-05, %v3094_v45 }
0x14bb   :  { %v3095_v49 = vadd.f32 1e-05, %v3093_v47 }
0x14bc   :  { %4409 = vrsqrt.f32 %v3096_v48 }
0x14bd   :  { %4411 = vrsqrt.f32 %v3095_v49 }
0x14c6   :  { %v4410_v50 = vpop.eup %4409 }
0x14c7   :  { %v4412_v54 = vpop.eup %4411  ;;  %v3100_v55 = vmul.f32 %v4410_v50, %v3084_v33 }
0x14c8   :  { %v3099_v56 = vmul.f32 %v4412_v54, %v3083_v34 }
0x14c9   :  { %v3108_v58 = vmul.f32 %v3607_v51, %v3100_v55 }
0x14ca   :  { %v3107_v59 = vmul.f32 %v3607_v51, %v3099_v56 }
0x14cb   :  { %v5050_v52 = vadd.f32 %v3608_v57, %v3108_v58 }
0x14cc   :  { %v5048_v53 = vadd.f32 %v3608_v57, %v3107_v59 }
0x14ce   :  { %4110 = vmatprep.mubr.msk.f32.mxu1 %vm80_vm0, %v5048_v53 }
0x14cf   :  { %4111 = vmatmul.mubr.msk.f32.vlgmr.msra.gmra.mrb[42].mxu1 %vm80_vm0, %v5050_v52 }
0x15a2   :  { %v4112_v15 = vpop.f32.mrb[42].mxu1 }
0x15a3   :  { %v3208_v23 = vadd.f32 %v4112_v15, %v3614_v22  ;;  %v3202_v25 = vpop.f32.mrb[43].mxu1 }
0x15a4   :  { %v3203_v26 = vadd.f32 %v3614_v22, %v3202_v25  ;;  %v3639_v22 = vld [vmem:[%s5164_s19] ss:$0 sm:$0xff] }
0x15a5   :  { %v3212_v27 = vmul.f32 %v3208_v23, %v3208_v23 }
0x15a6   :  { %v3211_v28 = vmul.f32 %v3203_v26, %v3203_v26 }
0x15a7   :  { %v3214_v29 = vmul.f32 %v3212_v27, %v3208_v23 }
0x15a8   :  { %v3213_v30 = vmul.f32 %v3211_v28, %v3203_v26 }
0x15a9   :  { %v3216_v12 = vmul.f32 0.044715, %v3214_v29 }
0x15aa   :  { %v3215_v5 = vmul.f32 0.044715, %v3213_v30 }
0x15ab   :  { %v3218_v32 = vadd.f32 %v3216_v12, %v3208_v23 }
0x15ac   :  { %v3217_v33 = vadd.f32 %v3215_v5, %v3203_v26 }
0x15ad   :  { %v3220_v34 = vmul.f32 0.7978846, %v3218_v32 }
0x15ae   :  { %v3219_v36 = vmul.f32 0.7978846, %v3217_v33 }
0x15af   :  { %4413 = vtanh.f32 %v3220_v34 }
0x15b0   :  { %4415 = vtanh.f32 %v3219_v36 }
0x15b9   :  { %v4414_v37 = vpop.eup %4413 }
0x15ba   :  { %v4416_v38 = vpop.eup %4415  ;;  %v3224_v24 = vadd.f32 1.0, %v4414_v37 }
0x15bb   :  { %v3223_v17 = vadd.f32 1.0, %v4416_v38 }
0x15bc   :  { %v3226_v39 = vmul.f32 0.5, %v3224_v24 }
0x15bd   :  { %v3225_v40 = vmul.f32 0.5, %v3223_v17 }
0x15be   :  { %v3228_v42 = vmul.f32 %v3226_v39, %v3208_v23 }
0x15bf   :  { %v3227_v41 = vmul.f32 %v3225_v40, %v3203_v26 }
0x15c1   :  { %4145 = vmatprep.mubr.f32.mxu0 %v3227_v41 }
0x15c2   :  { %4146 = vmatmul.mubr.f32.vlgmr.msra.gmra.mrb[22].mxu0 %v3228_v42 }
0x1695   :  { %v4147_v44 = vpop.f32.mrb[22].mxu0 }
0x1696   :  { %v3326_v45 = vadd.f32 %v4147_v44, %v3634_v43  ;;  %v3320_v46 = vpop.f32.mrb[23].mxu0 }
0x1697   :  { %v3321_v47 = vadd.f32 %v3634_v43, %v3320_v46 }
0x1698   :  { %v3330_v48 = vadd.f32 %v3326_v45, %v5050_v52 }
0x1699   :  { %v3329_v49 = vadd.f32 %v3321_v47, %v5048_v53  ;;  %v3377_v53 = vld [vmem:[%s5163_s18] sm:$0xff] }
0x169a   :  { %v3338_v50 = vsel %vm80_vm0, %v3330_v48, 0.0  ;;  %v4351_v62 = vpack.c.bf16 %v3378_v31, %v3377_v53 }
0x169b   :  { %3339 = vadd.xlane.f32.xlu1 %v3338_v50  ;;  %v3335_v51 = vsel %vm80_vm0, %v3329_v49, 0.0 }
0x169c   :  { %3336 = vadd.xlane.f32.xlu0 %v3335_v51  ;;  %4352 = vmatprep.subr.bf16.mxu1 %v4351_v62 }
0x169d   :  { %4354 = vmatpush3.bf16.msra.mxu1 %v4351_v62 }
0x169e   :  { %4356 = vmatprep.subr.bf16.mxu1 %v4355_v35 }
0x16a1   :  { %4358 = vmatpush3.bf16.msra.mxu1 %v4355_v35 }
0x1728   :  { %v3340_v54 = vpop.xlane.xlu1 %3339 }
0x1729   :  { %v3342_v55 = vmul.f32 0.03125, %v3340_v54  ;;  %v3337_v56 = vpop.xlane.xlu0 %3336 }
0x172a   :  { %v3341_v57 = vmul.f32 0.03125, %v3337_v56 }
0x172b   :  { %v3344_v58 = vsub.f32 %v3330_v48, %v3342_v55 }
0x172c   :  { %v3343_v59 = vsub.f32 %v3329_v49, %v3341_v57 }
0x172d   :  { %v3346_v60 = vmul.f32 %v3344_v58, %v3344_v58 }
0x172e   :  { %v3345_v14 = vmul.f32 %v3343_v59, %v3343_v59 }
0x172f   :  { %v3350_v61 = vsel %vm80_vm0, %v3346_v60, 0.0 }
0x1730   :  { %3351 = vadd.xlane.f32.xlu1 %v3350_v61  ;;  %v3347_v52 = vsel %vm80_vm0, %v3345_v14, 0.0 }
0x1731   :  { %3348 = vadd.xlane.f32.xlu0 %v3347_v52 }
0x17bd   :  { %v3352_v1 = vpop.xlane.xlu1 %3351 }
0x17be   :  { %v3354_v2 = vmul.f32 0.03125, %v3352_v1  ;;  %v3349_v3 = vpop.xlane.xlu0 %3348 }
0x17bf   :  { %v3353_v4 = vmul.f32 0.03125, %v3349_v3 }
0x17c0   :  { %v3356_v6 = vadd.f32 1e-05, %v3354_v2 }
0x17c1   :  { %v3355_v7 = vadd.f32 1e-05, %v3353_v4 }
0x17c2   :  { %4417 = vrsqrt.f32 %v3356_v6 }
0x17c3   :  { %4419 = vrsqrt.f32 %v3355_v7 }
0x17cc   :  { %v4418_v8 = vpop.eup %4417 }
0x17cd   :  { %v4420_v10 = vpop.eup %4419  ;;  %v3360_v11 = vmul.f32 %v4418_v8, %v3344_v58 }
0x17ce   :  { %v3359_v13 = vmul.f32 %v4420_v10, %v3343_v59 }
0x17cf   :  { %v3368_v18 = vmul.f32 %v3637_v9, %v3360_v11 }
0x17d0   :  { %v3367_v19 = vmul.f32 %v3637_v9, %v3359_v13 }
0x17d1   :  { %v3376_v21 = vadd.f32 %v3638_v16, %v3368_v18 }
0x17d2   :  { %v3375_v20 = vadd.f32 %v3638_v16, %v3367_v19 }
0x17d4   :  { %4156 = vmatprep.mubr.msk.f32.mxu1 %vm80_vm0, %v3375_v20 }
0x17d5   :  { %4157 = vmatmul.mubr.msk.f32.vlgmr.msra.gmra.mrb[44].mxu1 %vm80_vm0, %v3376_v21 }
0x18a8   :  { %v4158_v15 = vpop.f32.mrb[44].mxu1 }
0x18a9   :  { %v3466_v23 = vadd.f32 %v4158_v15, %v3639_v22  ;;  %v3460_v25 = vpop.f32.mrb[45].mxu1 }
0x18aa   :  { %v3461_v26 = vadd.f32 %v3639_v22, %v3460_v25 }
0x18ab   :  { %3470 = vst [vmem:[%s5165_s20 + $0x8] sm:$0xff] %v3466_v23 }
0x18ac   :  { %3469 = vst [vmem:[%s5165_s20] sm:$0xff] %v3461_v26 }

</bundles_post_ra>
